<compile_context>
chip_gen: v7x
topology: tpu7x:2x2x1
jax: 0.10.0
libtpu: 0.0.40
codegen_flags: <defaults>
</compile_context>

<pallas_src>
import jax
import jax.numpy as jnp
from jax import lax
from jax.experimental import pallas as pl
from jax.experimental.pallas import tpu as pltpu

FILTER = 3
PAD = FILTER - 1  # nn.Conv1d(..., kernel_size=3, padding=2)


def _round_up(x, m):
    return (x + m - 1) // m * m


def _title_encoder_kernel(x_ref, w1_ref, b1_ref, w2_ref, b2_ref,
                          wl_ref, bl_ref, o_ref, c1_ref, c2_ref):
    """Fused conv1d x2 + ReLU + max-over-time + linear + tanh for one N-tile.

    x_ref  : (TN, S, E)      bf16 embedded tokens
    w1_ref : (3E, E)         bf16 conv1 weight, im2col layout [k*E + ci, co]
    b1_ref : (1, E)          f32
    w2_ref : (3E, E)         bf16 conv2 weight
    b2_ref : (1, E)          f32
    wl_ref : (E, E)          bf16 linear weight (stored transposed: in x out)
    bl_ref : (1, E)          f32
    o_ref  : (TN, E)         f32 output
    c1_ref : (TN, T1P, 3E)   bf16 conv1 im2col scratch (band k = padded x shifted by k)
    c2_ref : (TN, T2P, 3E)   bf16 conv2 im2col scratch
    """
    TN, S, E = x_ref.shape
    T1 = S + PAD                    # conv1 output length
    T2 = T1 + PAD                   # conv2 output length
    T1P = c1_ref.shape[1]           # 8-aligned number of conv1 rows computed
    T2P = c2_ref.shape[1]
    zdt = c1_ref.dtype
    mxu_dtype = w1_ref.dtype

    # ---- conv1 im2col: band k holds zero-padded x shifted by k taps ----
    x = x_ref[...]                  # bf16, no cast
    for k in range(FILTER):
        lo = PAD - k
        band = slice(k * E, (k + 1) * E)
        if lo > 0:                                        # leading conv padding
            c1_ref[:, 0:lo, band] = jnp.zeros((TN, lo, E), zdt)
        c1_ref[:, lo:lo + S, band] = x
        if lo + S < T1P:                                  # trailing pad + 8-align rows
            c1_ref[:, lo + S:T1P, band] = jnp.zeros((TN, T1P - lo - S, E), zdt)

    acc1 = jnp.dot(c1_ref[...].reshape(TN * T1P, FILTER * E), w1_ref[...],
                   preferred_element_type=jnp.float32)
    out1 = jnp.maximum(acc1 + b1_ref[...], 0.0).reshape(TN, T1P, E)
    out1_b = out1[:, :T1, :].astype(zdt)                  # single bf16 cast, valid rows only

    # ---- conv2 im2col built from relu(conv1) ----
    for k in range(FILTER):
        lo = PAD - k
        band = slice(k * E, (k + 1) * E)
        if lo > 0:
            c2_ref[:, 0:lo, band] = jnp.zeros((TN, lo, E), zdt)
        c2_ref[:, lo:lo + T1, band] = out1_b
        if lo + T1 < T2P:
            c2_ref[:, lo + T1:T2P, band] = jnp.zeros((TN, T2P - lo - T1, E), zdt)

    acc2 = jnp.dot(c2_ref[...].reshape(TN * T2P, FILTER * E), w2_ref[...],
                   preferred_element_type=jnp.float32)
    out2 = jnp.maximum(acc2 + b2_ref[...], 0.0).reshape(TN, T2P, E)

    # ---- max over *valid* time positions (small grid-invariant mask) ----
    t_idx = lax.broadcasted_iota(jnp.int32, (1, T2P, 1), 1)
    out2 = jnp.where(t_idx < T2, out2, 0.0)               # post-ReLU, so 0 is neutral
    maxv = jnp.max(out2, axis=1)                          # (TN, E) f32

    # ---- linear head + tanh ----
    y = jnp.dot(maxv.astype(mxu_dtype), wl_ref[...],
                preferred_element_type=jnp.float32) + bl_ref[...]
    o_ref[...] = jnp.tanh(y)


def title_encode_pallas(x_emb, w1s, b1, w2s, b2, wl_t, bl, *,
                        tile_n=256, vmem_limit_bytes=48 * 1024 * 1024):
    """x_emb: (N, S, E) embedded tokens -> (N, E) encoded titles (float32)."""
    N, S, E = x_emb.shape
    T1, T2 = S + PAD, S + 2 * PAD
    T1P, T2P = _round_up(T1, 8), _round_up(T2, 8)

    compute_dtype = w1s.dtype
    x_emb = x_emb.astype(compute_dtype)

    # Tile N: largest tile <= tile_n, but keep >= 2 grid steps whenever there
    # is enough work so both v7x TensorCores get a share (N axis is "parallel").
    n8 = _round_up(N, 8)
    num_tiles = pl.cdiv(n8, tile_n)
    if n8 > 8:
        num_tiles = max(num_tiles, 2)
    tn = _round_up(pl.cdiv(n8, num_tiles), 8)
    n_pad = tn * num_tiles
    if n_pad != N:
        x_emb = jnp.pad(x_emb, ((0, n_pad - N), (0, 0), (0, 0)))
    grid = (num_tiles,)

    flops = 2 * n_pad * (T1P + T2P) * (FILTER * E) * E + 2 * n_pad * E * E
    bytes_accessed = (x_emb.size * x_emb.dtype.itemsize
                      + n_pad * E * 4
                      + (w1s.size + w2s.size + wl_t.size) * w1s.dtype.itemsize
                      + (b1.size + b2.size + bl.size) * 4)

    out = pl.pallas_call(
        _title_encoder_kernel,
        out_shape=jax.ShapeDtypeStruct((n_pad, E), jnp.float32),
        grid_spec=pltpu.PrefetchScalarGridSpec(
            num_scalar_prefetch=0,
            grid=grid,
            in_specs=[
                pl.BlockSpec((tn, S, E), lambda i: (i, 0, 0)),      # x tile (pipelined)
                pl.BlockSpec((FILTER * E, E), lambda i: (0, 0)),    # w1 (resident)
                pl.BlockSpec((1, E), lambda i: (0, 0)),             # b1
                pl.BlockSpec((FILTER * E, E), lambda i: (0, 0)),    # w2
                pl.BlockSpec((1, E), lambda i: (0, 0)),             # b2
                pl.BlockSpec((E, E), lambda i: (0, 0)),             # wl
                pl.BlockSpec((1, E), lambda i: (0, 0)),             # bl
            ],
            out_specs=pl.BlockSpec((tn, E), lambda i: (i, 0)),
            scratch_shapes=[
                pltpu.VMEM((tn, T1P, FILTER * E), compute_dtype),   # conv1 im2col (bf16)
                pltpu.VMEM((tn, T2P, FILTER * E), compute_dtype),   # conv2 im2col (bf16)
            ],
        ),
        compiler_params=pltpu.CompilerParams(
            dimension_semantics=("parallel",),           # shard N across TCs (v7x)
            vmem_limit_bytes=vmem_limit_bytes,
        ),
        cost_estimate=pl.CostEstimate(
            flops=int(flops),
            transcendentals=int(n_pad * E),
            bytes_accessed=int(bytes_accessed)),
    )(x_emb, w1s, b1, w2s, b2, wl_t, bl)
    return out[:N]


class TitleEncoderPallas:
    """JAX/Pallas port of TitleEncoder.  Parameters are created deterministically."""

    def __init__(self, vocab_size, emb_dim, key):
        ks = jax.random.split(key, 7)
        s = 0.1
        self.vocab_size, self.emb_dim = vocab_size, emb_dim
        # nn.Embedding(vocab_size, emb_dim) -- stored bf16 (halves HBM reads of x).
        self.embed = (jax.random.normal(ks[0], (vocab_size, emb_dim)) * s).astype(jnp.bfloat16)
        # nn.Conv1d(E, E, 3, padding=2) weights generated as (K, C_in, C_out),
        # stacked to im2col layout (3E, E).
        w1 = jax.random.normal(ks[1], (FILTER, emb_dim, emb_dim)) * s
        w2 = jax.random.normal(ks[3], (FILTER, emb_dim, emb_dim)) * s
        self.w1s = w1.reshape(FILTER * emb_dim, emb_dim).astype(jnp.bfloat16)
        self.w2s = w2.reshape(FILTER * emb_dim, emb_dim).astype(jnp.bfloat16)
        self.b1 = (jax.random.normal(ks[2], (1, emb_dim)) * s).astype(jnp.float32)
        self.b2 = (jax.random.normal(ks[4], (1, emb_dim)) * s).astype(jnp.float32)
        # nn.Linear(E, E): store W^T so the kernel does maxv @ W^T + b.
        self.wl_t = (jax.random.normal(ks[5], (emb_dim, emb_dim)) * s).astype(jnp.bfloat16)
        self.bl = (jax.random.normal(ks[6], (1, emb_dim)) * s).astype(jnp.float32)

    def _params(self):
        return (self.w1s, self.b1, self.w2s, self.b2, self.wl_t, self.bl)

    def __call__(self, input_ids, is_query=False):
        # TODO(synk): tokenizer step is host-side text processing, no kernel equivalent.
        if is_query:
            x = self.embed[input_ids]                     # (B, S, E) gather = glue JAX
            return title_encode_pallas(x, *self._params())
        B, L, S = input_ids.shape
        x = self.embed[input_ids.reshape(B * L, S)]       # (B*L, S, E)
        out = title_encode_pallas(x, *self._params())
        return out.reshape(B, L, -1)


# -------- pure-JAX reference (XLA conv), mirroring the kernel's bf16 operand casts --------
def _reference(x_emb, w1s, b1, w2s, b2, wl_t, bl):
    N, S, E = x_emb.shape
    x = jnp.transpose(x_emb, (0, 2, 1))                          # (N, E, S) == PyTorch NCW
    w1 = jnp.transpose(w1s.reshape(FILTER, E, E), (2, 1, 0))     # (Co, Ci, K)
    w2 = jnp.transpose(w2s.reshape(FILTER, E, E), (2, 1, 0))
    dn = ('NCH', 'OIH', 'NCH')
    y = lax.conv_general_dilated(x, w1, (1,), [(PAD, PAD)], dimension_numbers=dn,
                                 preferred_element_type=jnp.float32)
    y = jnp.maximum(y + b1[0][None, :, None], 0.0)
    y = lax.conv_general_dilated(y.astype(jnp.bfloat16), w2, (1,), [(PAD, PAD)],
                                 dimension_numbers=dn,
                                 preferred_element_type=jnp.float32)
    y = jnp.maximum(y + b2[0][None, :, None], 0.0)
    y = jnp.max(y, axis=2)                                       # (N, E)
    y = jnp.dot(y.astype(jnp.bfloat16), wl_t, preferred_element_type=jnp.float32) + bl
    return jnp.tanh(y)


if __name__ == "__main__":
    VOCAB, E, S, B, L = 64, 128, 8, 2, 2   # lane-dense E (multiple of 128)

    enc = TitleEncoderPallas(VOCAB, E, jax.random.PRNGKey(0))

    kq, kd = jax.random.split(jax.random.PRNGKey(0))
    q_ids = jax.random.randint(kq, (B, S), 0, VOCAB, dtype=jnp.int32)      # query titles
    d_ids = jax.random.randint(kd, (B, L, S), 0, VOCAB, dtype=jnp.int32)   # doc title lists

    q_out = enc(q_ids, is_query=True)     # (B, E)
    d_out = enc(d_ids, is_query=False)    # (B, L, E)
    jax.block_until_ready((q_out, d_out))

    # verify against the XLA reference
    q_ref = _reference(enc.embed[q_ids], *enc._params())
    d_ref = _reference(enc.embed[d_ids.reshape(B * L, S)], *enc._params()).reshape(B, L, E)
    assert q_out.shape == (B, E) and d_out.shape == (B, L, E)
    assert jnp.allclose(q_out, q_ref, atol=1e-2, rtol=1e-2), \
        float(jnp.max(jnp.abs(q_out - q_ref)))
    assert jnp.allclose(d_out, d_ref, atol=1e-2, rtol=1e-2), \
        float(jnp.max(jnp.abs(d_out - d_ref)))

    print("KERNEL_OK")
</pallas_src>

<mosaic_0001>
module attributes {stable_mosaic.version = 11 : i64} {
  func.func @_title_encoder_kernel(%arg0: i32, %arg1: memref<8x8x128xbf16, #tpu.memory_space<vmem>>, %arg2: memref<384x128xbf16, #tpu.memory_space<vmem>>, %arg3: memref<1x128xf32, #tpu.memory_space<vmem>>, %arg4: memref<384x128xbf16, #tpu.memory_space<vmem>>, %arg5: memref<1x128xf32, #tpu.memory_space<vmem>>, %arg6: memref<128x128xbf16, #tpu.memory_space<vmem>>, %arg7: memref<1x128xf32, #tpu.memory_space<vmem>>, %arg8: memref<8x128xf32, #tpu.memory_space<vmem>>, %arg9: memref<8x16x384xbf16, #tpu.memory_space<vmem>>, %arg10: memref<8x16x384xbf16, #tpu.memory_space<vmem>>) attributes {dimension_semantics = [#tpu.dimension_semantics<parallel>], iteration_bounds = array<i64: 1>, scalar_prefetch = 0 : i64, scratch_operands = 2 : i64, tpu.core_type = #tpu.core_type<tc>, window_params = [{transform_indices = @transform_0, window_bounds = array<i64: 8, 8, 128>}, {pipeline_mode = #tpu.pipeline_mode<synchronous>, transform_indices = @transform_1, window_bounds = array<i64: 384, 128>}, {pipeline_mode = #tpu.pipeline_mode<synchronous>, transform_indices = @transform_2, window_bounds = array<i64: 1, 128>}, {pipeline_mode = #tpu.pipeline_mode<synchronous>, transform_indices = @transform_3, window_bounds = array<i64: 384, 128>}, {pipeline_mode = #tpu.pipeline_mode<synchronous>, transform_indices = @transform_4, window_bounds = array<i64: 1, 128>}, {pipeline_mode = #tpu.pipeline_mode<synchronous>, transform_indices = @transform_5, window_bounds = array<i64: 128, 128>}, {pipeline_mode = #tpu.pipeline_mode<synchronous>, transform_indices = @transform_6, window_bounds = array<i64: 1, 128>}, {transform_indices = @transform_7, window_bounds = array<i64: 8, 128>}]} {
    %c0 = arith.constant 0 : index
    %c0_0 = arith.constant 0 : index
    %c0_1 = arith.constant 0 : index
    %0 = vector.load %arg1[%c0, %c0_0, %c0_1] : memref<8x8x128xbf16, #tpu.memory_space<vmem>>, vector<8x8x128xbf16>
    %cst = arith.constant 0.000000e+00 : bf16
    %1 = vector.broadcast %cst : bf16 to vector<8x2x128xbf16>
    %c0_2 = arith.constant 0 : index
    %c0_3 = arith.constant 0 : index
    %c0_4 = arith.constant 0 : index
    %2 = vector.load %arg9[%c0_2, %c0_3, %c0_4] : memref<8x16x384xbf16, #tpu.memory_space<vmem>>, vector<8x2x128xbf16>
    tpu.vector_store %arg9[%c0_2, %c0_3, %c0_4], %1 {strides = array<i32>} : memref<8x16x384xbf16, #tpu.memory_space<vmem>>, vector<8x2x128xbf16>,
    %c0_5 = arith.constant 0 : index
    %c2 = arith.constant 2 : index
    %c0_6 = arith.constant 0 : index
    %3 = vector.load %arg9[%c0_5, %c2, %c0_6] : memref<8x16x384xbf16, #tpu.memory_space<vmem>>, vector<8x8x128xbf16>
    tpu.vector_store %arg9[%c0_5, %c2, %c0_6], %0 {strides = array<i32>} : memref<8x16x384xbf16, #tpu.memory_space<vmem>>, vector<8x8x128xbf16>,
    %cst_7 = arith.constant 0.000000e+00 : bf16
    %4 = vector.broadcast %cst_7 : bf16 to vector<8x6x128xbf16>
    %c0_8 = arith.constant 0 : index
    %c10 = arith.constant 10 : index
    %c0_9 = arith.constant 0 : index
    %5 = vector.load %arg9[%c0_8, %c10, %c0_9] : memref<8x16x384xbf16, #tpu.memory_space<vmem>>, vector<8x6x128xbf16>
    tpu.vector_store %arg9[%c0_8, %c10, %c0_9], %4 {strides = array<i32>} : memref<8x16x384xbf16, #tpu.memory_space<vmem>>, vector<8x6x128xbf16>,
    %cst_10 = arith.constant 0.000000e+00 : bf16
    %6 = vector.broadcast %cst_10 : bf16 to vector<8x1x128xbf16>
    %c0_11 = arith.constant 0 : index
    %c0_12 = arith.constant 0 : index
    %c128 = arith.constant 128 : index
    %7 = vector.load %arg9[%c0_11, %c0_12, %c128] : memref<8x16x384xbf16, #tpu.memory_space<vmem>>, vector<8x1x128xbf16>
    tpu.vector_store %arg9[%c0_11, %c0_12, %c128], %6 {strides = array<i32>} : memref<8x16x384xbf16, #tpu.memory_space<vmem>>, vector<8x1x128xbf16>,
    %c0_13 = arith.constant 0 : index
    %c1 = arith.constant 1 : index
    %c128_14 = arith.constant 128 : index
    %8 = vector.load %arg9[%c0_13, %c1, %c128_14] : memref<8x16x384xbf16, #tpu.memory_space<vmem>>, vector<8x8x128xbf16>
    tpu.vector_store %arg9[%c0_13, %c1, %c128_14], %0 {strides = array<i32>} : memref<8x16x384xbf16, #tpu.memory_space<vmem>>, vector<8x8x128xbf16>,
    %cst_15 = arith.constant 0.000000e+00 : bf16
    %9 = vector.broadcast %cst_15 : bf16 to vector<8x7x128xbf16>
    %c0_16 = arith.constant 0 : index
    %c9 = arith.constant 9 : index
    %c128_17 = arith.constant 128 : index
    %10 = vector.load %arg9[%c0_16, %c9, %c128_17] : memref<8x16x384xbf16, #tpu.memory_space<vmem>>, vector<8x7x128xbf16>
    tpu.vector_store %arg9[%c0_16, %c9, %c128_17], %9 {strides = array<i32>} : memref<8x16x384xbf16, #tpu.memory_space<vmem>>, vector<8x7x128xbf16>,
    %c0_18 = arith.constant 0 : index
    %c0_19 = arith.constant 0 : index
    %c256 = arith.constant 256 : index
    %11 = vector.load %arg9[%c0_18, %c0_19, %c256] : memref<8x16x384xbf16, #tpu.memory_space<vmem>>, vector<8x8x128xbf16>
    tpu.vector_store %arg9[%c0_18, %c0_19, %c256], %0 {strides = array<i32>} : memref<8x16x384xbf16, #tpu.memory_space<vmem>>, vector<8x8x128xbf16>,
    %cst_20 = arith.constant 0.000000e+00 : bf16
    %12 = vector.broadcast %cst_20 : bf16 to vector<8x8x128xbf16>
    %c0_21 = arith.constant 0 : index
    %c8 = arith.constant 8 : index
    %c256_22 = arith.constant 256 : index
    %13 = vector.load %arg9[%c0_21, %c8, %c256_22] : memref<8x16x384xbf16, #tpu.memory_space<vmem>>, vector<8x8x128xbf16>
    tpu.vector_store %arg9[%c0_21, %c8, %c256_22], %12 {strides = array<i32>} : memref<8x16x384xbf16, #tpu.memory_space<vmem>>, vector<8x8x128xbf16>,
    %c0_23 = arith.constant 0 : index
    %c0_24 = arith.constant 0 : index
    %c0_25 = arith.constant 0 : index
    %14 = vector.load %arg9[%c0_23, %c0_24, %c0_25] : memref<8x16x384xbf16, #tpu.memory_space<vmem>>, vector<8x16x384xbf16>
    %15 = vector.shape_cast %14 : vector<8x16x384xbf16> to vector<128x384xbf16>
    %c0_26 = arith.constant 0 : index
    %c0_27 = arith.constant 0 : index
    %16 = vector.load %arg2[%c0_26, %c0_27] : memref<384x128xbf16, #tpu.memory_space<vmem>>, vector<384x128xbf16>
    %cst_28 = arith.constant dense<0.000000e+00> : vector<128x128xf32>
    %17 = tpu.matmul %15, %16, %cst_28 {dimension_numbers = #tpu.dot_dimension_numbers<[1], [0], [0], [1], [0, 0, 1, 1], [], []>} : vector<128x384xbf16>, vector<384x128xbf16>, vector<128x128xf32> -> vector<128x128xf32>
    %c0_29 = arith.constant 0 : index
    %c0_30 = arith.constant 0 : index
    %18 = vector.load %arg3[%c0_29, %c0_30] : memref<1x128xf32, #tpu.memory_space<vmem>>, vector<1x128xf32>
    %19 = vector.broadcast %18 : vector<1x128xf32> to vector<128x128xf32>
    %20 = arith.addf %17, %19 : vector<128x128xf32>
    %cst_31 = arith.constant 0.000000e+00 : f32
    %21 = vector.broadcast %cst_31 : f32 to vector<128x128xf32>
    %22 = arith.maximumf %20, %21 : vector<128x128xf32>
    %23 = vector.shape_cast %22 : vector<128x128xf32> to vector<8x16x128xf32>
    %24 = vector.extract_strided_slice %23 {offsets = [0, 0, 0], sizes = [8, 10, 128], strides = [1, 1, 1]} : vector<8x16x128xf32> to vector<8x10x128xf32>
    %25 = arith.truncf %24 : vector<8x10x128xf32> to vector<8x10x128xbf16>
    %cst_32 = arith.constant 0.000000e+00 : bf16
    %26 = vector.broadcast %cst_32 : bf16 to vector<8x2x128xbf16>
    %c0_33 = arith.constant 0 : index
    %c0_34 = arith.constant 0 : index
    %c0_35 = arith.constant 0 : index
    %27 = vector.load %arg10[%c0_33, %c0_34, %c0_35] : memref<8x16x384xbf16, #tpu.memory_space<vmem>>, vector<8x2x128xbf16>
    tpu.vector_store %arg10[%c0_33, %c0_34, %c0_35], %26 {strides = array<i32>} : memref<8x16x384xbf16, #tpu.memory_space<vmem>>, vector<8x2x128xbf16>,
    %c0_36 = arith.constant 0 : index
    %c2_37 = arith.constant 2 : index
    %c0_38 = arith.constant 0 : index
    %28 = vector.load %arg10[%c0_36, %c2_37, %c0_38] : memref<8x16x384xbf16, #tpu.memory_space<vmem>>, vector<8x10x128xbf16>
    tpu.vector_store %arg10[%c0_36, %c2_37, %c0_38], %25 {strides = array<i32>} : memref<8x16x384xbf16, #tpu.memory_space<vmem>>, vector<8x10x128xbf16>,
    %cst_39 = arith.constant 0.000000e+00 : bf16
    %29 = vector.broadcast %cst_39 : bf16 to vector<8x4x128xbf16>
    %c0_40 = arith.constant 0 : index
    %c12 = arith.constant 12 : index
    %c0_41 = arith.constant 0 : index
    %30 = vector.load %arg10[%c0_40, %c12, %c0_41] : memref<8x16x384xbf16, #tpu.memory_space<vmem>>, vector<8x4x128xbf16>
    tpu.vector_store %arg10[%c0_40, %c12, %c0_41], %29 {strides = array<i32>} : memref<8x16x384xbf16, #tpu.memory_space<vmem>>, vector<8x4x128xbf16>,
    %cst_42 = arith.constant 0.000000e+00 : bf16
    %31 = vector.broadcast %cst_42 : bf16 to vector<8x1x128xbf16>
    %c0_43 = arith.constant 0 : index
    %c0_44 = arith.constant 0 : index
    %c128_45 = arith.constant 128 : index
    %32 = vector.load %arg10[%c0_43, %c0_44, %c128_45] : memref<8x16x384xbf16, #tpu.memory_space<vmem>>, vector<8x1x128xbf16>
    tpu.vector_store %arg10[%c0_43, %c0_44, %c128_45], %31 {strides = array<i32>} : memref<8x16x384xbf16, #tpu.memory_space<vmem>>, vector<8x1x128xbf16>,
    %c0_46 = arith.constant 0 : index
    %c1_47 = arith.constant 1 : index
    %c128_48 = arith.constant 128 : index
    %33 = vector.load %arg10[%c0_46, %c1_47, %c128_48] : memref<8x16x384xbf16, #tpu.memory_space<vmem>>, vector<8x10x128xbf16>
    tpu.vector_store %arg10[%c0_46, %c1_47, %c128_48], %25 {strides = array<i32>} : memref<8x16x384xbf16, #tpu.memory_space<vmem>>, vector<8x10x128xbf16>,
    %cst_49 = arith.constant 0.000000e+00 : bf16
    %34 = vector.broadcast %cst_49 : bf16 to vector<8x5x128xbf16>
    %c0_50 = arith.constant 0 : index
    %c11 = arith.constant 11 : index
    %c128_51 = arith.constant 128 : index
    %35 = vector.load %arg10[%c0_50, %c11, %c128_51] : memref<8x16x384xbf16, #tpu.memory_space<vmem>>, vector<8x5x128xbf16>
    tpu.vector_store %arg10[%c0_50, %c11, %c128_51], %34 {strides = array<i32>} : memref<8x16x384xbf16, #tpu.memory_space<vmem>>, vector<8x5x128xbf16>,
    %c0_52 = arith.constant 0 : index
    %c0_53 = arith.constant 0 : index
    %c256_54 = arith.constant 256 : index
    %36 = vector.load %arg10[%c0_52, %c0_53, %c256_54] : memref<8x16x384xbf16, #tpu.memory_space<vmem>>, vector<8x10x128xbf16>
    tpu.vector_store %arg10[%c0_52, %c0_53, %c256_54], %25 {strides = array<i32>} : memref<8x16x384xbf16, #tpu.memory_space<vmem>>, vector<8x10x128xbf16>,
    %cst_55 = arith.constant 0.000000e+00 : bf16
    %37 = vector.broadcast %cst_55 : bf16 to vector<8x6x128xbf16>
    %c0_56 = arith.constant 0 : index
    %c10_57 = arith.constant 10 : index
    %c256_58 = arith.constant 256 : index
    %38 = vector.load %arg10[%c0_56, %c10_57, %c256_58] : memref<8x16x384xbf16, #tpu.memory_space<vmem>>, vector<8x6x128xbf16>
    tpu.vector_store %arg10[%c0_56, %c10_57, %c256_58], %37 {strides = array<i32>} : memref<8x16x384xbf16, #tpu.memory_space<vmem>>, vector<8x6x128xbf16>,
    %c0_59 = arith.constant 0 : index
    %c0_60 = arith.constant 0 : index
    %c0_61 = arith.constant 0 : index
    %39 = vector.load %arg10[%c0_59, %c0_60, %c0_61] : memref<8x16x384xbf16, #tpu.memory_space<vmem>>, vector<8x16x384xbf16>
    %40 = vector.shape_cast %39 : vector<8x16x384xbf16> to vector<128x384xbf16>
    %c0_62 = arith.constant 0 : index
    %c0_63 = arith.constant 0 : index
    %41 = vector.load %arg4[%c0_62, %c0_63] : memref<384x128xbf16, #tpu.memory_space<vmem>>, vector<384x128xbf16>
    %cst_64 = arith.constant dense<0.000000e+00> : vector<128x128xf32>
    %42 = tpu.matmul %40, %41, %cst_64 {dimension_numbers = #tpu.dot_dimension_numbers<[1], [0], [0], [1], [0, 0, 1, 1], [], []>} : vector<128x384xbf16>, vector<384x128xbf16>, vector<128x128xf32> -> vector<128x128xf32>
    %c0_65 = arith.constant 0 : index
    %c0_66 = arith.constant 0 : index
    %43 = vector.load %arg5[%c0_65, %c0_66] : memref<1x128xf32, #tpu.memory_space<vmem>>, vector<1x128xf32>
    %44 = vector.broadcast %43 : vector<1x128xf32> to vector<128x128xf32>
    %45 = arith.addf %42, %44 : vector<128x128xf32>
    %cst_67 = arith.constant 0.000000e+00 : f32
    %46 = vector.broadcast %cst_67 : f32 to vector<128x128xf32>
    %47 = arith.maximumf %45, %46 : vector<128x128xf32>
    %48 = vector.shape_cast %47 : vector<128x128xf32> to vector<8x16x128xf32>
    %49 = tpu.iota {dimensions = array<i32: 1>} : vector<1x16x1xi32>
    %c12_i32 = arith.constant 12 : i32
    %50 = vector.broadcast %c12_i32 : i32 to vector<1x16x1xi32>
    %51 = arith.cmpi slt, %49, %50 : vector<1x16x1xi32>
    %cst_68 = arith.constant 0.000000e+00 : f32
    %52 = vector.shape_cast %51 : vector<1x16x1xi1> to vector<1x16x1xi1>
    %53 = vector.broadcast %52 : vector<1x16x1xi1> to vector<8x16x128xi1>
    %54 = vector.broadcast %cst_68 : f32 to vector<8x16x128xf32>
    %55 = arith.select %53, %48, %54 : vector<8x16x128xi1>, vector<8x16x128xf32>
    %cst_69 = arith.constant dense<0xFF800000> : vector<8x128xf32>
    %56 = vector.multi_reduction <maximumf>, %55, %cst_69 [1] : vector<8x16x128xf32> to vector<8x128xf32>
    %57 = arith.truncf %56 : vector<8x128xf32> to vector<8x128xbf16>
    %c0_70 = arith.constant 0 : index
    %c0_71 = arith.constant 0 : index
    %58 = vector.load %arg6[%c0_70, %c0_71] : memref<128x128xbf16, #tpu.memory_space<vmem>>, vector<128x128xbf16>
    %cst_72 = arith.constant dense<0.000000e+00> : vector<8x128xf32>
    %59 = tpu.matmul %57, %58, %cst_72 {dimension_numbers = #tpu.dot_dimension_numbers<[1], [0], [0], [1], [0, 0, 1, 1], [], []>} : vector<8x128xbf16>, vector<128x128xbf16>, vector<8x128xf32> -> vector<8x128xf32>
    %c0_73 = arith.constant 0 : index
    %c0_74 = arith.constant 0 : index
    %60 = vector.load %arg7[%c0_73, %c0_74] : memref<1x128xf32, #tpu.memory_space<vmem>>, vector<1x128xf32>
    %61 = vector.broadcast %60 : vector<1x128xf32> to vector<8x128xf32>
    %62 = arith.addf %59, %61 : vector<8x128xf32>
    %63 = math.tanh %62 : vector<8x128xf32>
    %c0_75 = arith.constant 0 : index
    %c0_76 = arith.constant 0 : index
    %64 = vector.load %arg8[%c0_75, %c0_76] : memref<8x128xf32, #tpu.memory_space<vmem>>, vector<8x128xf32>
    tpu.vector_store %arg8[%c0_75, %c0_76], %63 {strides = array<i32>} : memref<8x128xf32, #tpu.memory_space<vmem>>, vector<8x128xf32>,
    return
  }
  func.func @transform_0(%arg0: i32) -> (i32, i32, i32) {
    %c0_i32 = arith.constant 0 : i32
    %c0_i32_0 = arith.constant 0 : i32
    %c0_i32_1 = arith.constant 0 : i32
    return %arg0, %c0_i32, %c0_i32_0 : i32, i32, i32
  }
  func.func @transform_1(%arg0: i32) -> (i32, i32) {
    %c0_i32 = arith.constant 0 : i32
    %c0_i32_0 = arith.constant 0 : i32
    %c0_i32_1 = arith.constant 0 : i32
    return %c0_i32, %c0_i32_0 : i32, i32
  }
  func.func @transform_2(%arg0: i32) -> (i32, i32) {
    %c0_i32 = arith.constant 0 : i32
    %c0_i32_0 = arith.constant 0 : i32
    %c0_i32_1 = arith.constant 0 : i32
    return %c0_i32, %c0_i32_0 : i32, i32
  }
  func.func @transform_3(%arg0: i32) -> (i32, i32) {
    %c0_i32 = arith.constant 0 : i32
    %c0_i32_0 = arith.constant 0 : i32
    %c0_i32_1 = arith.constant 0 : i32
    return %c0_i32, %c0_i32_0 : i32, i32
  }
  func.func @transform_4(%arg0: i32) -> (i32, i32) {
    %c0_i32 = arith.constant 0 : i32
    %c0_i32_0 = arith.constant 0 : i32
    %c0_i32_1 = arith.constant 0 : i32
    return %c0_i32, %c0_i32_0 : i32, i32
  }
  func.func @transform_5(%arg0: i32) -> (i32, i32) {
    %c0_i32 = arith.constant 0 : i32
    %c0_i32_0 = arith.constant 0 : i32
    %c0_i32_1 = arith.constant 0 : i32
    return %c0_i32, %c0_i32_0 : i32, i32
  }
  func.func @transform_6(%arg0: i32) -> (i32, i32) {
    %c0_i32 = arith.constant 0 : i32
    %c0_i32_0 = arith.constant 0 : i32
    %c0_i32_1 = arith.constant 0 : i32
    return %c0_i32, %c0_i32_0 : i32, i32
  }
  func.func @transform_7(%arg0: i32) -> (i32, i32) {
    %c0_i32 = arith.constant 0 : i32
    %c0_i32_0 = arith.constant 0 : i32
    return %arg0, %c0_i32 : i32, i32
  }
}

</mosaic_0001>

<bundles_post_ra>
// kernel: tpu_custom_call.1
= control target key start
LH: loop header
LB: loop body
LE: loop exit
PB: predicated region body
PF: predicated region fallthrough
CT: control target
= control target key end

     0   :  { %12 = vsyncpa [#allocation5], 0  ;;  %s2539_s0 = inlined_call_operand.hbm [shape: bf16[8,8,128], index: 0, kind: input, shape index: {}]   ;;  %s2540_s1 = inlined_call_operand.hbm [shape: bf16[384,128], index: 1, kind: input, shape index: {}]   ;;  %s2541_s2 = inlined_call_operand.vmem [shape: f32[1,128], index: 2, kind: input, shape index: {}]   ;;  %s2542_s3 = inlined_call_operand.hbm [shape: bf16[384,128], index: 3, kind: input, shape index: {}]   ;;  %s2543_s4 = inlined_call_operand.vmem [shape: f32[1,128], index: 4, kind: input, shape index: {}]   ;;  %s2544_s5 = inlined_call_operand.hbm [shape: bf16[128,128], index: 5, kind: input, shape index: {}]   ;;  %s2545_s6 = inlined_call_operand.vmem [shape: f32[1,128], index: 6, kind: input, shape index: {}]   ;;  %s2546_s7 = inlined_call_operand.hbm [shape: f32[8,128], index: 7, kind: output, shape index: {}]  }
   0x1   :  { %13 = vsyncpa [#allocation8], 0 }
   0x2   :  { %14 = vsyncpa [#allocation11], 0 }
   0x3   :  { %15 = vsyncpa [#allocation6], 0  ;;  %s2161_s24 = smov [#allocation7]   ;;  %s2162_s26 = smov [#allocation4]  }
   0x4   :  { %s33_s25 = sshll.u32 %s2161_s24, 4  ;;  %s21_s27 = sshll.u32 %s2162_s26, 4  ;;  %s34_s25 = int_to_ptr.vmem [resolvable:$true] %s33_s25  ;;  %s2211_s27 = int_to_ptr.vmem [resolvable:$true] %s21_s27 }
   0x5   :  { %s2043_s30 = scalar_lea.hbm %s2540_s1, 3072 }
   0x6   :  { %p2044_p0 = scmp.ne.s32.totalorder %s2540_s1, %s2043_s30  ;;  %p2047_p1 = scmp.lt.u32.totalorder %s2043_s30, %s2540_s1 }
   0x8   :  { %p2049_p2 = pnand %p2047_p1, %p2044_p0 }
   0xa   :  { %2052 = shalt.err (!%p2049_p2)
}
   0xb   :  { %s2053_s12 = scalar_lea.vmem %s34_s25, 3072  ;;  %p2058_p4 = scmp.lt.s32.totalorder %s34_s25, %s34_s25 }
   0xc   :  { %p2054_p3 = scmp.ne.s32.totalorder %s34_s25, %s2053_s12  ;;  %p2059_p5 = scmp.lt.s32.totalorder %s2053_s12, %s2053_s12 }
   0xe   :  { %p2060_p6 = por %p2059_p5, %p2058_p4 }
  0x10   :  { %p2061_p7 = pnand %p2060_p6, %p2054_p3 }
  0x12   :  { %2064 = shalt.err (!%p2061_p7)
}
  0x13   :  { %s2163_s13 = smov 64   ;;  %s2164_s14 = smov 4  }
  0x14   :  { %39 = dma.hbm_to_vmem [thread:$0]  %s2540_s1, 3072, %s34_s25, [#allocation8], %s2163_s13, %s2163_s13, %s2164_s14  }
  0x15   :  { %s2065_s19 = scalar_lea.hbm %s2539_s0, 512 }
  0x16   :  { %p2066_p8 = scmp.ne.s32.totalorder %s2539_s0, %s2065_s19  ;;  %p2069_p9 = scmp.lt.u32.totalorder %s2065_s19, %s2539_s0 }
  0x18   :  { %p2071_p10 = pnand %p2069_p9, %p2066_p8 }
  0x1a   :  { %2074 = shalt.err (!%p2071_p10)
}
  0x1b   :  { %s2075_s24 = scalar_lea.vmem %s2211_s27, 512  ;;  %p2080_p12 = scmp.lt.s32.totalorder %s2211_s27, %s2211_s27 }
  0x1c   :  { %p2076_p11 = scmp.ne.s32.totalorder %s2211_s27, %s2075_s24  ;;  %p2081_p13 = scmp.lt.s32.totalorder %s2075_s24, %s2075_s24 }
  0x1e   :  { %p2082_p0 = por %p2081_p13, %p2080_p12 }
  0x20   :  { %p2083_p1 = pnand %p2082_p0, %p2076_p11 }
  0x22   :  { %2086 = shalt.err (!%p2083_p1)
}
  0x23   :  { %27 = dma.hbm_to_vmem [thread:$0]  %s2539_s0, 512, %s2211_s27, [#allocation5], %s2163_s13, %s2163_s13, %s2164_s14  }
  0x24   :  { %s2165_s26 = smov [#allocation9]   ;;  %s2166_s29 = smov [#allocation10]  }
  0x25   :  { %s47_s28 = sshll.u32 %s2165_s26, 4  ;;  %s61_s30 = sshll.u32 %s2166_s29, 4  ;;  %s48_s28 = int_to_ptr.vmem [resolvable:$true] %s47_s28  ;;  %s2248_s30 = int_to_ptr.vmem [resolvable:$true] %s61_s30 }
  0x26   :  { %s2087_s10 = scalar_lea.hbm %s2542_s3, 3072 }
  0x27   :  { %p2088_p2 = scmp.ne.s32.totalorder %s2542_s3, %s2087_s10  ;;  %p2091_p3 = scmp.lt.u32.totalorder %s2087_s10, %s2542_s3 }
  0x29   :  { %p2093_p4 = pnand %p2091_p3, %p2088_p2 }
  0x2b   :  { %2096 = shalt.err (!%p2093_p4)
}
  0x2c   :  { %s2097_s0 = scalar_lea.vmem %s48_s28, 3072  ;;  %p2102_p6 = scmp.lt.s32.totalorder %s48_s28, %s48_s28 }
  0x2d   :  { %p2098_p5 = scmp.ne.s32.totalorder %s48_s28, %s2097_s0  ;;  %p2103_p7 = scmp.lt.s32.totalorder %s2097_s0, %s2097_s0 }
  0x2f   :  { %p2104_p8 = por %p2103_p7, %p2102_p6 }
  0x31   :  { %p2105_p9 = pnand %p2104_p8, %p2098_p5 }
  0x33   :  { %2108 = shalt.err (!%p2105_p9)
}
  0x34   :  { %53 = dma.hbm_to_vmem [thread:$0]  %s2542_s3, 3072, %s48_s28, [#allocation8], %s2163_s13, %s2163_s13, %s2164_s14  }
  0x35   :  { %s2109_s20 = scalar_lea.hbm %s2544_s5, 1024 }
  0x36   :  { %p2110_p10 = scmp.ne.s32.totalorder %s2544_s5, %s2109_s20  ;;  %p2113_p11 = scmp.lt.u32.totalorder %s2109_s20, %s2544_s5 }
  0x38   :  { %p2115_p12 = pnand %p2113_p11, %p2110_p10 }
  0x3a   :  { %2118 = shalt.err (!%p2115_p12)
}
  0x3b   :  { %s2119_s1 = scalar_lea.vmem %s2248_s30, 1024  ;;  %p2124_p0 = scmp.lt.s32.totalorder %s2248_s30, %s2248_s30 }
  0x3c   :  { %p2120_p13 = scmp.ne.s32.totalorder %s2248_s30, %s2119_s1  ;;  %p2125_p1 = scmp.lt.s32.totalorder %s2119_s1, %s2119_s1 }
  0x3e   :  { %p2126_p2 = por %p2125_p1, %p2124_p0 }
  0x40   :  { %p2127_p3 = pnand %p2126_p2, %p2120_p13 }
  0x42   :  { %2130 = shalt.err (!%p2127_p3)
}
  0x43   :  { %67 = dma.hbm_to_vmem [thread:$0]  %s2544_s5, 1024, %s2248_s30, [#allocation11], %s2163_s13, %s2163_s13, %s2164_s14  }
  0x44   :  { %2153 = dma.done.wait [#allocation5], 512  }
  0x45   :  { %2154 = vsyncadd [#allocation5], 4294966784 }
  0x46   :  { %2155 = dma.done.wait [#allocation8], 6144  }
  0x47   :  { %2156 = vsyncadd [#allocation8], 4294961152 }
  0x48   :  { %2157 = dma.done.wait [#allocation11], 1024  }
  0x49   :  { %2158 = vsyncadd [#allocation11], 4294966272  ;;  %v2167_v0 = vmov 0   ;;  %v1977_v1 = vld [vmem:[#allocation7 + $0x40] sm:$0xff]   ;;  %v1980_v4 = vld [vmem:[#allocation7 + $0x48] sm:$0xff]   ;;  %vm155_vm1 = vcmask 1040384  }
  0x4a   :  { %91 = vst [vmem:[#allocation2] sm:$0x1] %v2167_v0  ;;  %147 = vst [vmem:[#allocation2] sm:$0xe0] %v2167_v0  ;;  %v1978_v2 = vld [vmem:[#allocation7] sm:$0xff]   ;;  %1714 = vmatprep.subr.bf16.mxu0 %v1977_v1  ;;  %v1981_v5 = vld [vmem:[#allocation7 + $0x8] sm:$0xff]  }
  0x4b   :  { %92 = vst [vmem:[#allocation2 + $0x18] sm:$0x1] %v2167_v0  ;;  %93 = vst [vmem:[#allocation2 + $0x30] sm:$0x1] %v2167_v0  ;;  %v1979_v3 = vld [vmem:[#allocation7 + $0x80] sm:$0xff]   ;;  %1715 = vmatpush3.bf16.msra.mxu0 %v1978_v2  ;;  %v1982_v6 = vld [vmem:[#allocation7 + $0x88] sm:$0xff]  }
  0x4c   :  { %94 = vst [vmem:[#allocation2 + $0x48] sm:$0x1] %v2167_v0  ;;  %95 = vst [vmem:[#allocation2 + $0x60] sm:$0x1] %v2167_v0  ;;  %1883 = vmatprep.subr.bf16.mxu1 %v1979_v3  ;;  %1716 = vmatprep.subr.bf16.mxu0 %v1980_v4  ;;  %v1983_v7 = vld [vmem:[#allocation7 + $0x50] sm:$0xff]   ;;  %v1986_v10 = vld [vmem:[#allocation7 + $0x58] sm:$0xff]  }
  0x4d   :  { %96 = vst [vmem:[#allocation2 + $0x78] sm:$0x1] %v2167_v0  ;;  %97 = vst [vmem:[#allocation2 + $0x90] sm:$0x1] %v2167_v0  ;;  %1884 = vmatpush3.bf16.msra.mxu1 %v1979_v3  ;;  %v1984_v8 = vld [vmem:[#allocation7 + $0x10] sm:$0xff]   ;;  %v1987_v11 = vld [vmem:[#allocation7 + $0x18] sm:$0xff]  }
  0x4e   :  { %98 = vst [vmem:[#allocation2 + $0xa8] sm:$0x1] %v2167_v0  ;;  %148 = vst [vmem:[#allocation2 + $0x18] sm:$0xe0] %v2167_v0  ;;  %1885 = vmatprep.subr.bf16.mxu1 %v1982_v6  ;;  %v1985_v9 = vld [vmem:[#allocation7 + $0x90] sm:$0xff]   ;;  %v1988_v12 = vld [vmem:[#allocation7 + $0x98] sm:$0xff]  }
  0x4f   :  { %149 = vst [vmem:[#allocation2 + $0x30] sm:$0xe0] %v2167_v0  ;;  %150 = vst [vmem:[#allocation2 + $0x48] sm:$0xe0] %v2167_v0  ;;  %1717 = vmatpush3.bf16.msra.mxu0 %v1981_v5  ;;  %v1989_v13 = vld [vmem:[#allocation7 + $0x60] sm:$0xff]   ;;  %v1992_v16 = vld [vmem:[#allocation7 + $0x68] sm:$0xff]  }
  0x50   :  { %151 = vst [vmem:[#allocation2 + $0x60] sm:$0xe0] %v2167_v0  ;;  %152 = vst [vmem:[#allocation2 + $0x78] sm:$0xe0] %v2167_v0  ;;  %1718 = vmatprep.subr.bf16.mxu0 %v1983_v7  ;;  %vm156_vm0 = vsmask.f32 256 }
  0x51   :  { %153 = vst [vmem:[#allocation2 + $0x90] sm:$0xe0] %v2167_v0  ;;  %154 = vst [vmem:[#allocation2 + $0xa8] sm:$0xe0] %v2167_v0  ;;  %1886 = vmatpush3.bf16.msra.mxu1 %v1982_v6  ;;  %v1991_v14 = vld [vmem:[#allocation7 + $0xa0] sm:$0xff]   ;;  %v1994_v18 = vld [vmem:[#allocation7 + $0xa8] sm:$0xff]  }
  0x52   :  { %308 = vst [vmem:[#allocation2 + $0x10] sm:$0xf0] %v2167_v0  ;;  %309 = vst [vmem:[#allocation2 + $0x28] sm:$0xf0] %v2167_v0  ;;  %1887 = vmatprep.subr.bf16.mxu1 %v1985_v9  ;;  %v1990_v15 = vld [vmem:[#allocation7 + $0x20] sm:$0xff]   ;;  %v1993_v19 = vld [vmem:[#allocation7 + $0x28] sm:$0xff]  }
  0x53   :  { %310 = vst [vmem:[#allocation2 + $0x40] sm:$0xf0] %v2167_v0  ;;  %311 = vst [vmem:[#allocation2 + $0x58] sm:$0xf0] %v2167_v0  ;;  %1719 = vmatpush3.bf16.msra.mxu0 %v1984_v8  ;;  %v1995_v20 = vld [vmem:[#allocation7 + $0x70] sm:$0xff]   ;;  %v1998_v23 = vld [vmem:[#allocation7 + $0x78] sm:$0xff]  }
  0x54   :  { %312 = vst [vmem:[#allocation2 + $0x70] sm:$0xf0] %v2167_v0  ;;  %313 = vst [vmem:[#allocation2 + $0x88] sm:$0xf0] %v2167_v0  ;;  %1720 = vmatprep.subr.bf16.mxu0 %v1986_v10  ;;  %vm247_vm3 = vsmask.f32 4354 }
  0x55   :  { %314 = vst [vmem:[#allocation2 + $0xa0] sm:$0xf0] %v2167_v0  ;;  %315 = vst [vmem:[#allocation2 + $0xb8] sm:$0xf0] %v2167_v0  ;;  %1888 = vmatpush3.bf16.msra.mxu1 %v1985_v9  ;;  %v1996_v21 = vld [vmem:[#allocation7 + $0x30] sm:$0xff]   ;;  %vm246_vm4 = vcmask 1044480  }
  0x56   :  { %757 = vst [vmem:[#allocation3] sm:$0x1] %v2167_v0  ;;  %758 = vst [vmem:[#allocation3 + $0x18] sm:$0x1] %v2167_v0  ;;  %1889 = vmatprep.subr.bf16.mxu1 %v1988_v12  ;;  %v1997_v22 = vld [vmem:[#allocation7 + $0xb0] sm:$0xff]   ;;  %v1999_v27 = vld [vmem:[#allocation7 + $0x38] sm:$0xff]  }
  0x57   :  { %759 = vst [vmem:[#allocation3 + $0x30] sm:$0x1] %v2167_v0  ;;  %760 = vst [vmem:[#allocation3 + $0x48] sm:$0x1] %v2167_v0  ;;  %1721 = vmatpush3.bf16.msra.mxu0 %v1987_v11  ;;  %v83_v24 = vld [vmem:[#allocation4] sm:$0xf] }
  0x58   :  { %761 = vst [vmem:[#allocation3 + $0x60] sm:$0x1] %v2167_v0  ;;  %762 = vst [vmem:[#allocation3 + $0x78] sm:$0x1] %v2167_v0  ;;  %1722 = vmatprep.subr.bf16.mxu0 %v1989_v13  ;;  %v158_v25 = vld [vmem:[#allocation2 + $0x8] sm:$0x1]  ;;  %v1647_v29 = vcombine.low %v83_v24, %v83_v24 }
  0x59   :  { %763 = vst [vmem:[#allocation3 + $0x90] sm:$0x1] %v2167_v0  ;;  %764 = vst [vmem:[#allocation3 + $0xa8] sm:$0x1] %v2167_v0  ;;  %1890 = vmatpush3.bf16.msra.mxu1 %v1988_v12  ;;  %v84_v26 = vld [vmem:[#allocation4 + $0x4] sm:$0xf] }
  0x5a   :  { %797 = vst [vmem:[#allocation3] sm:$0xc0] %v2167_v0  ;;  %798 = vst [vmem:[#allocation3 + $0x18] sm:$0xc0] %v2167_v0  ;;  %1891 = vmatprep.subr.bf16.mxu1 %v1991_v14  ;;  %v2289_v28 = vld [vmem:[#allocation7 + $0xb8] sm:$0xff]   ;;  %v1648_v31 = vcombine.low %v84_v26, %v84_v26  ;;  %v2295_v38 = vld [vmem:[#allocation9 + $0x80] sm:$0xff]  }
  0x5b   :  { %799 = vst [vmem:[#allocation3 + $0x30] sm:$0xc0] %v2167_v0  ;;  %800 = vst [vmem:[#allocation3 + $0x48] sm:$0xc0] %v2167_v0  ;;  %1723 = vmatpush3.bf16.msra.mxu0 %v1990_v15  ;;  %v161_v32 = vld [vmem:[#allocation2 + $0x20] sm:$0x1] }
  0x5c   :  { %801 = vst [vmem:[#allocation3 + $0x60] sm:$0xc0] %v2167_v0  ;;  %802 = vst [vmem:[#allocation3 + $0x78] sm:$0xc0] %v2167_v0  ;;  %1724 = vmatprep.subr.bf16.mxu0 %v1992_v16  ;;  %v85_v33 = vld [vmem:[#allocation4 + $0x8] sm:$0xf] }
  0x5d   :  { %803 = vst [vmem:[#allocation3 + $0x90] sm:$0xc0] %v2167_v0  ;;  %804 = vst [vmem:[#allocation3 + $0xa8] sm:$0xc0] %v2167_v0  ;;  %1892 = vmatpush3.bf16.msra.mxu1 %v1991_v14  ;;  %v1649_v35 = vcombine.low %v85_v33, %v85_v33  ;;  %v164_v36 = vld [vmem:[#allocation2 + $0x38] sm:$0x1] }
  0x5e   :  { %955 = vst [vmem:[#allocation3 + $0x10] sm:$0xe0] %v2167_v0  ;;  %956 = vst [vmem:[#allocation3 + $0x28] sm:$0xe0] %v2167_v0  ;;  %1893 = vmatprep.subr.bf16.mxu1 %v1994_v18  ;;  %v86_v37 = vld [vmem:[#allocation4 + $0xc] sm:$0xf] }
  0x5f   :  { %957 = vst [vmem:[#allocation3 + $0x40] sm:$0xe0] %v2167_v0  ;;  %958 = vst [vmem:[#allocation3 + $0x58] sm:$0xe0] %v2167_v0  ;;  %1725 = vmatpush3.bf16.msra.mxu0 %v1993_v19  ;;  %v183_v39 = vshrl.u32 %v1647_v29, 16  ;;  %v186_v40 = vshll.u32 %v1647_v29, 16  ;;  %v1650_v55 = vcombine.low %v86_v37, %v86_v37 }
  0x60   :  { %959 = vst [vmem:[#allocation3 + $0x70] sm:$0xe0] %v2167_v0  ;;  %960 = vst [vmem:[#allocation3 + $0x88] sm:$0xe0] %v2167_v0  ;;  %1726 = vmatprep.subr.bf16.mxu0 %v1995_v20  ;;  %v123_v41 = vrot.slane %v1647_v29, 7  ;;  %v190_v42 = vshrl.u32 %v1648_v31, 16 }
  0x61   :  { %961 = vst [vmem:[#allocation3 + $0xa0] sm:$0xe0] %v2167_v0  ;;  %962 = vst [vmem:[#allocation3 + $0xb8] sm:$0xe0] %v2167_v0  ;;  %1894 = vmatpush3.bf16.msra.mxu1 %v1994_v18  ;;  %v167_v43 = vld [vmem:[#allocation2 + $0x50] sm:$0x1] }
  0x62   :  { %vm2285_vm2 = vmand %vm155_vm1, %vm156_vm0  ;;  %300 = vst [vmem:[#allocation2 + $0x10] sm:$0xf] %v83_v24  ;;  %1895 = vmatprep.subr.bf16.mxu1 %v1997_v22  ;;  %v193_v44 = vshll.u32 %v1648_v31, 16  ;;  %v124_v45 = vrot.slane %v1648_v31, 7  ;;  %v197_v47 = vshrl.u32 %v1649_v35, 16  ;;  %v185_v49 = vrot.slane %v183_v39, 7 }
  0x63   :  { %v159_v30 = vsel %vm2285_vm2, 0, %v158_v25  ;;  %301 = vst [vmem:[#allocation2 + $0x28] sm:$0xf] %v84_v26  ;;  %v162_v34 = vsel %vm2285_vm2, 0, %v161_v32  ;;  %302 = vst [vmem:[#allocation2 + $0x40] sm:$0xf] %v85_v33  ;;  %1727 = vmatpush3.bf16.msra.mxu0 %v1996_v21 }
  0x64   :  { %160 = vst [vmem:[#allocation2 + $0x8] sm:$0x1] %v159_v30  ;;  %163 = vst [vmem:[#allocation2 + $0x20] sm:$0x1] %v162_v34  ;;  %1728 = vmatprep.subr.bf16.mxu0 %v1998_v23  ;;  %v165_v46 = vsel %vm2285_vm2, 0, %v164_v36  ;;  %vm273_vm5 = vcmask 1047556   ;;  %v188_v59 = vor.u32 %v186_v40, %v185_v49 }
  0x65   :  { %303 = vst [vmem:[#allocation2 + $0x58] sm:$0xf] %v86_v37  ;;  %v87_v48 = vld [vmem:[#allocation4 + $0x10] sm:$0xf]  ;;  %1896 = vmatpush3.bf16.msra.mxu1 %v1997_v22  ;;  %vm274_vm6 = vsmask.f32 7954  ;;  %vm2304_vm7 = vmand %vm246_vm4, %vm247_vm3 }
  0x66   :  { %139 = vst [vmem:[#allocation2] sm:$0x1e] %v123_v41  ;;  %v192_v50 = vrot.slane %v190_v42, 7  ;;  %166 = vst [vmem:[#allocation2 + $0x38] sm:$0x1] %v165_v46  ;;  %v200_v51 = vshll.u32 %v1649_v35, 16  ;;  %1897 = vmatprep.subr.bf16.mxu1 %v2289_v28  ;;  %v1651_v57 = vcombine.low %v87_v48, %v87_v48 }
  0x67   :  { %v125_v52 = vrot.slane %v1649_v35, 7  ;;  %v170_v53 = vld [vmem:[#allocation2 + $0x68] sm:$0x1]  ;;  %304 = vst [vmem:[#allocation2 + $0x70] sm:$0xf] %v87_v48  ;;  %v199_v54 = vrot.slane %v197_v47, 7  ;;  %1729 = vmatpush3.bf16.msra.mxu0 %v1999_v27  ;;  %vm2333_vm8 = vmand %vm273_vm5, %vm274_vm6 }
  0x68   :  { %140 = vst [vmem:[#allocation2 + $0x18] sm:$0x1e] %v124_v45  ;;  %v168_v56 = vsel %vm2285_vm2, 0, %v167_v43  ;;  %v88_v58 = vld [vmem:[#allocation4 + $0x14] sm:$0xf]  ;;  %v195_v61 = vor.u32 %v193_v44, %v192_v50  ;;  %v171_v62 = vsel %vm2285_vm2, 0, %v170_v53  ;;  %1915 = vmatprep.subr.bf16.mxu0 %v2295_v38 }
  0x69   :  { %141 = vst [vmem:[#allocation2 + $0x30] sm:$0x1e] %v125_v52  ;;  %169 = vst [vmem:[#allocation2 + $0x50] sm:$0x1] %v168_v56  ;;  %v2310_v63 = vcombine.low %v88_v58, %v88_v58  ;;  %v173_v0 = vld [vmem:[#allocation2 + $0x80] sm:$0x1]  ;;  %v202_v3 = vor.u32 %v200_v51, %v199_v54  ;;  %1898 = vmatpush3.bf16.msra.mxu1 %v2289_v28 }
  0x6a   :  { %305 = vst [vmem:[#allocation2 + $0x88] sm:$0xf] %v88_v58  ;;  %v89_v1 = vld [vmem:[#allocation4 + $0x18] sm:$0xf]  ;;  %v318_v2 = vld [vmem:[#allocation2 + $0x10] sm:$0xff]  ;;  %v204_v4 = vshrl.u32 %v1650_v55, 16 }
  0x6b   :  { %v207_v5 = vshll.u32 %v1650_v55, 16  ;;  %v126_v6 = vrot.slane %v1650_v55, 7  ;;  %172 = vst [vmem:[#allocation2 + $0x68] sm:$0x1] %v171_v62  ;;  %v176_v7 = vld [vmem:[#allocation2 + $0x98] sm:$0x1]  ;;  %1899 = vmatprep.mubr.bf16.mxu1 %v318_v2  ;;  %v1653_v13 = vcombine.low %v89_v1, %v89_v1 }
  0x6c   :  { %306 = vst [vmem:[#allocation2 + $0xa0] sm:$0xf] %v89_v1  ;;  %v249_v8 = vld [vmem:[#allocation2 + $0x8] sm:$0x1f]  ;;  %v211_v10 = vshrl.u32 %v1651_v57, 16  ;;  %v214_v11 = vshll.u32 %v1651_v57, 16 }
  0x6d   :  { %v321_v9 = vld [vmem:[#allocation2 + $0x28] sm:$0xff]  ;;  %v127_v12 = vrot.slane %v1651_v57, 7  ;;  %v250_v14 = vsel %vm2304_vm7, %v188_v59, %v249_v8  ;;  %v252_v15 = vld [vmem:[#allocation2 + $0x20] sm:$0x1f]  ;;  %v206_v18 = vrot.slane %v204_v4, 7  ;;  %v218_v19 = vshrl.u32 %v2310_v63, 16 }
  0x6e   :  { %v324_v16 = vld [vmem:[#allocation2 + $0x40] sm:$0xff]  ;;  %142 = vst [vmem:[#allocation2 + $0x48] sm:$0x1e] %v126_v6  ;;  %v221_v20 = vshll.u32 %v2310_v63, 16  ;;  %251 = vst [vmem:[#allocation2 + $0x8] sm:$0x1f] %v250_v14  ;;  %v253_v21 = vsel %vm2304_vm7, %v195_v61, %v252_v15  ;;  %1900 = vmatmul.mubr.bf16.vlgmr.msra.gmra.mrb[0].mxu1 %v321_v9 }
  0x6f   :  { %v213_v22 = vrot.slane %v211_v10, 7  ;;  %143 = vst [vmem:[#allocation2 + $0x60] sm:$0x1e] %v127_v12  ;;  %v174_v23 = vsel %vm2285_vm2, 0, %v173_v0  ;;  %v128_v24 = vrot.slane %v2310_v63, 7  ;;  %v209_v27 = vor.u32 %v207_v5, %v206_v18  ;;  %1903 = vmatprep.mubr.bf16.mxu1 %v324_v16  ;;  %v327_v50 = vld [vmem:[#allocation2 + $0x58] sm:$0xff] }
  0x70   :  { %v90_v25 = vld [vmem:[#allocation4 + $0x1c] sm:$0xf]  ;;  %254 = vst [vmem:[#allocation2 + $0x20] sm:$0x1f] %v253_v21  ;;  %v220_v28 = vrot.slane %v218_v19, 7  ;;  %v177_v29 = vsel %vm2285_vm2, 0, %v176_v7 }
  0x71   :  { %v255_v26 = vld [vmem:[#allocation2 + $0x38] sm:$0x1f]  ;;  %175 = vst [vmem:[#allocation2 + $0x80] sm:$0x1] %v174_v23  ;;  %v1654_v30 = vcombine.low %v90_v25, %v90_v25  ;;  %307 = vst [vmem:[#allocation2 + $0xb8] sm:$0xf] %v90_v25  ;;  %v216_v32 = vor.u32 %v214_v11, %v213_v22 }
  0x72   :  { %v256_v31 = vsel %vm2304_vm7, %v202_v3, %v255_v26  ;;  %144 = vst [vmem:[#allocation2 + $0x78] sm:$0x1e] %v128_v24  ;;  %178 = vst [vmem:[#allocation2 + $0x98] sm:$0x1] %v177_v29  ;;  %v225_v33 = vshrl.u32 %v1653_v13, 16  ;;  %v228_v34 = vshll.u32 %v1653_v13, 16  ;;  %v223_v47 = vor.u32 %v221_v20, %v220_v28 }
  0x73   :  { %v179_v35 = vld [vmem:[#allocation2 + $0xb0] sm:$0x1]  ;;  %257 = vst [vmem:[#allocation2 + $0x38] sm:$0x1f] %v256_v31  ;;  %v129_v37 = vrot.slane %v1653_v13, 7  ;;  %v232_v39 = vshrl.u32 %v1654_v30, 16 }
  0x74   :  { %v258_v36 = vld [vmem:[#allocation2 + $0x50] sm:$0x1f]  ;;  %v261_v41 = vld [vmem:[#allocation2 + $0x68] sm:$0x1f]  ;;  %v227_v42 = vrot.slane %v225_v33, 7  ;;  %v235_v43 = vshll.u32 %v1654_v30, 16 }
  0x75   :  { %v259_v40 = vsel %vm2304_vm7, %v209_v27, %v258_v36  ;;  %v180_v44 = vsel %vm2285_vm2, 0, %v179_v35  ;;  %v262_v46 = vsel %vm2304_vm7, %v216_v32, %v261_v41  ;;  %145 = vst [vmem:[#allocation2 + $0x90] sm:$0x1e] %v129_v37  ;;  %v234_v48 = vrot.slane %v232_v39, 7  ;;  %v276_v52 = vld [vmem:[#allocation2 + $0x8] sm:$0xf0] }
  0x76   :  { %260 = vst [vmem:[#allocation2 + $0x50] sm:$0x1f] %v259_v40  ;;  %181 = vst [vmem:[#allocation2 + $0xb0] sm:$0x1] %v180_v44  ;;  %v130_v49 = vrot.slane %v1654_v30, 7  ;;  %v230_v51 = vor.u32 %v228_v34, %v227_v42  ;;  %v330_v53 = vld [vmem:[#allocation2 + $0x70] sm:$0xff]  ;;  %1904 = vmatmul.mubr.bf16.gmra.mrb[4].mxu1 %v327_v50 }
  0x77   :  { %263 = vst [vmem:[#allocation2 + $0x68] sm:$0x1f] %v262_v46  ;;  %v277_v54 = vsel %vm2333_vm8, 0, %v276_v52  ;;  %v279_v55 = vld [vmem:[#allocation2 + $0x20] sm:$0xf0]  ;;  %v237_v61 = vor.u32 %v235_v43, %v234_v48  ;;  %1907 = vmatprep.mubr.bf16.mxu1 %v330_v53  ;;  %v333_v6 = vld [vmem:[#allocation2 + $0x88] sm:$0xff] }
  0x78   :  { %146 = vst [vmem:[#allocation2 + $0xa8] sm:$0x1e] %v130_v49  ;;  %v264_v56 = vld [vmem:[#allocation2 + $0x80] sm:$0x1f]  ;;  %278 = vst [vmem:[#allocation2 + $0x8] sm:$0xf0] %v277_v54 }
  0x79   :  { %v280_v57 = vsel %vm2333_vm8, 0, %v279_v55  ;;  %v265_v58 = vsel %vm2304_vm7, %v223_v47, %v264_v56  ;;  %v267_v59 = vld [vmem:[#allocation2 + $0x98] sm:$0x1f]  ;;  %v316_v3 = vld [vmem:[#allocation2] sm:$0xff]  ;;  %v322_v21 = vld [vmem:[#allocation2 + $0x30] sm:$0xff]  ;;  %vm893_vm9 = vcmask 1045504  }
  0x7a   :  { %281 = vst [vmem:[#allocation2 + $0x20] sm:$0xf0] %v280_v57  ;;  %v282_v62 = vld [vmem:[#allocation2 + $0x38] sm:$0xf0]  ;;  %266 = vst [vmem:[#allocation2 + $0x80] sm:$0x1f] %v265_v58  ;;  %v268_v63 = vsel %vm2304_vm7, %v230_v51, %v267_v59 }
  0x7b   :  { %v283_v0 = vsel %vm2333_vm8, 0, %v282_v62  ;;  %269 = vst [vmem:[#allocation2 + $0x98] sm:$0x1f] %v268_v63  ;;  %v336_v9 = vld [vmem:[#allocation2 + $0xa0] sm:$0xff]  ;;  %v319_v15 = vld [vmem:[#allocation2 + $0x18] sm:$0xff]  ;;  %v325_v23 = vld [vmem:[#allocation2 + $0x48] sm:$0xff] }
  0x7c   :  { %284 = vst [vmem:[#allocation2 + $0x38] sm:$0xf0] %v283_v0  ;;  %v339_v16 = vld [vmem:[#allocation2 + $0xb8] sm:$0xff]  ;;  %v334_v28 = vld [vmem:[#allocation2 + $0x90] sm:$0xff]  ;;  %v2010_v31 = vld [vmem:[#allocation9 + $0x88] sm:$0xff]   ;;  %vm920_vm12 = vcmask 1047557  }
  0x7d   :  { %v285_v1 = vld [vmem:[#allocation2 + $0x50] sm:$0xf0]  ;;  %v331_v26 = vld [vmem:[#allocation2 + $0x78] sm:$0xff]  ;;  %v2011_v33 = vld [vmem:[#allocation9 + $0x40] sm:$0xff]   ;;  %vm894_vm10 = vsmask.f32 5378 }
  0x7e   :  { %v270_v2 = vld [vmem:[#allocation2 + $0xb0] sm:$0x1f]  ;;  %v286_v4 = vsel %vm2333_vm8, 0, %v285_v1  ;;  %v288_v5 = vld [vmem:[#allocation2 + $0x68] sm:$0xf0]  ;;  %1908 = vmatmul.mubr.bf16.gmra.mrb[8].mxu1 %v333_v6  ;;  %v2013_v34 = vld [vmem:[#allocation9] sm:$0xff]   ;;  %1794 = vmatprep.subr.bf16.mxu1 %v2011_v33 }
  0x7f   :  { %v271_v7 = vsel %vm2304_vm7, %v237_v61, %v270_v2  ;;  %287 = vst [vmem:[#allocation2 + $0x50] sm:$0xf0] %v286_v4  ;;  %v289_v8 = vsel %vm2333_vm8, 0, %v288_v5  ;;  %v317_v10 = vld [vmem:[#allocation2 + $0x8] sm:$0xff]  ;;  %1911 = vmatprep.mubr.bf16.mxu1 %v336_v9  ;;  %v2012_v32 = vld [vmem:[#allocation9 + $0x90] sm:$0xff]   ;;  %1795 = vmatpush3.bf16.msra.mxu1 %v2013_v34  ;;  %v2015_v35 = vld [vmem:[#allocation9 + $0x98] sm:$0xff]  }
  0x80   :  { %272 = vst [vmem:[#allocation2 + $0xb0] sm:$0x1f] %v271_v7  ;;  %290 = vst [vmem:[#allocation2 + $0x68] sm:$0xf0] %v289_v8  ;;  %571 = vmatprep.mubr.bf16.mxu0 %v317_v10  ;;  %v337_v30 = vld [vmem:[#allocation2 + $0xa8] sm:$0xff]  ;;  %v2018_v41 = vld [vmem:[#allocation9 + $0xa0] sm:$0xff]  }
  0x81   :  { %v320_v11 = vld [vmem:[#allocation2 + $0x20] sm:$0xff]  ;;  %572 = vmatmul.mubr.bf16.vlgmr.msra.gmra.mrb[0].mxu0 %v316_v3  ;;  %v2014_v36 = vld [vmem:[#allocation9 + $0x48] sm:$0xff]   ;;  %v2017_v42 = vld [vmem:[#allocation9 + $0x50] sm:$0xff]   ;;  %vm921_vm13 = vsmask.f32 7958  ;;  %vm2169_vm15 = vmmov 0  }
  0x82   :  { %v291_v12 = vld [vmem:[#allocation2 + $0x80] sm:$0xf0]  ;;  %v294_v14 = vld [vmem:[#allocation2 + $0x98] sm:$0xf0]  ;;  %579 = vmatprep.mubr.bf16.mxu0 %v320_v11  ;;  %1916 = vmatpush3.bf16.msra.mxu0 %v2295_v38  ;;  %v805_v37 = vld [vmem:[#allocation3 + $0x8] sm:$0x1] }
  0x83   :  { %v292_v13 = vsel %vm2333_vm8, 0, %v291_v12  ;;  %v295_v60 = vsel %vm2333_vm8, 0, %v294_v14  ;;  %v323_v19 = vld [vmem:[#allocation2 + $0x38] sm:$0xff]  ;;  %v328_v38 = vld [vmem:[#allocation2 + $0x60] sm:$0xff]  ;;  %1917 = vmatprep.subr.bf16.mxu0 %v2010_v31  ;;  %v806_v39 = vsel %vm2285_vm2, 0, %v805_v37  ;;  %1796 = vmatprep.subr.bf16.mxu1 %v2014_v36  ;;  %v2016_v40 = vld [vmem:[#allocation9 + $0x8] sm:$0xff]  }
  0x84   :  { %293 = vst [vmem:[#allocation2 + $0x80] sm:$0xf0] %v292_v13  ;;  %296 = vst [vmem:[#allocation2 + $0x98] sm:$0xf0] %v295_v60  ;;  %1797 = vmatpush3.bf16.msra.mxu1 %v2016_v40  ;;  %v2019_v43 = vld [vmem:[#allocation9 + $0x10] sm:$0xff]   ;;  %v2021_v44 = vld [vmem:[#allocation9 + $0xa8] sm:$0xff]  }
  0x85   :  { %807 = vst [vmem:[#allocation3 + $0x8] sm:$0x1] %v806_v39  ;;  %1798 = vmatprep.subr.bf16.mxu1 %v2017_v42  ;;  %v2020_v45 = vld [vmem:[#allocation9 + $0x58] sm:$0xff]   ;;  %v808_v46 = vld [vmem:[#allocation3 + $0x20] sm:$0x1]  ;;  %v2024_v49 = vld [vmem:[#allocation9 + $0xb0] sm:$0xff]  }
  0x86   :  { %1912 = vmatmul.mubr.bf16.gmra.mrb[12].mxu1 %v339_v16  ;;  %v326_v22 = vld [vmem:[#allocation2 + $0x50] sm:$0xff]  ;;  %1918 = vmatpush3.bf16.msra.mxu0 %v2010_v31  ;;  %v809_v47 = vsel %vm2285_vm2, 0, %v808_v46  ;;  %v2022_v48 = vld [vmem:[#allocation9 + $0x18] sm:$0xff]   ;;  %v2023_v50 = vld [vmem:[#allocation9 + $0x60] sm:$0xff]   ;;  %vm1524_vm1 = vcmask 1041409   ;;  %vm1528_vm3 = vcmask 1043459  }
  0x87   :  { %v297_v18 = vld [vmem:[#allocation2 + $0xb0] sm:$0xf0]  ;;  %v329_v24 = vld [vmem:[#allocation2 + $0x68] sm:$0xff]  ;;  %1919 = vmatprep.subr.bf16.mxu0 %v2012_v32  ;;  %810 = vst [vmem:[#allocation3 + $0x20] sm:$0x1] %v809_v47  ;;  %v2025_v51 = vld [vmem:[#allocation9 + $0x20] sm:$0xff]  }
  0x88   :  { %v298_v20 = vsel %vm2333_vm8, 0, %v297_v18  ;;  %1799 = vmatpush3.bf16.msra.mxu1 %v2019_v43  ;;  %v2027_v52 = vld [vmem:[#allocation9 + $0xb8] sm:$0xff]   ;;  %v2026_v53 = vld [vmem:[#allocation9 + $0x68] sm:$0xff]   ;;  %v2029_v57 = vld [vmem:[#allocation9 + $0x70] sm:$0xff]   ;;  %vm1530_vm4 = vcmask 1044484   ;;  %vm1532_vm5 = vcmask 1045509  }
  0x89   :  { %299 = vst [vmem:[#allocation2 + $0xb0] sm:$0xf0] %v298_v20  ;;  %580 = vmatmul.mubr.bf16.gmra.mrb[4].mxu0 %v319_v15  ;;  %1800 = vmatprep.subr.bf16.mxu1 %v2020_v45  ;;  %v811_v54 = vld [vmem:[#allocation3 + $0x38] sm:$0x1]  ;;  %v2028_v55 = vld [vmem:[#allocation9 + $0x28] sm:$0xff]   ;;  %v2030_v58 = vld [vmem:[#allocation9 + $0x30] sm:$0xff]  }
  0x8a   :  { %587 = vmatprep.mubr.bf16.mxu0 %v323_v19  ;;  %1920 = vmatpush3.bf16.msra.mxu0 %v2012_v32  ;;  %v812_v56 = vsel %vm2285_vm2, 0, %v811_v54  ;;  %v2031_v59 = vld [vmem:[#allocation9 + $0x78] sm:$0xff]   ;;  %v814_v61 = vld [vmem:[#allocation3 + $0x50] sm:$0x1]  ;;  %v817_v0 = vld [vmem:[#allocation3 + $0x68] sm:$0x1] }
  0x8b   :  { %v332_v25 = vld [vmem:[#allocation2 + $0x80] sm:$0xff]  ;;  %v335_v27 = vld [vmem:[#allocation2 + $0x98] sm:$0xff]  ;;  %1921 = vmatprep.subr.bf16.mxu0 %v2015_v35  ;;  %813 = vst [vmem:[#allocation3 + $0x38] sm:$0x1] %v812_v56  ;;  %v815_v63 = vsel %vm2285_vm2, 0, %v814_v61  ;;  %v818_v1 = vsel %vm2285_vm2, 0, %v817_v0  ;;  %vm2409_vm11 = vmand %vm893_vm9, %vm894_vm10 }
  0x8c   :  { %1801 = vmatpush3.bf16.msra.mxu1 %v2022_v48  ;;  %v2032_v62 = vld [vmem:[#allocation9 + $0x38] sm:$0xff]   ;;  %816 = vst [vmem:[#allocation3 + $0x50] sm:$0x1] %v815_v63  ;;  %819 = vst [vmem:[#allocation3 + $0x68] sm:$0x1] %v818_v1  ;;  %vm1534_vm6 = vcmask 1046534  }
  0x8d   :  { %1802 = vmatprep.subr.bf16.mxu1 %v2023_v50  ;;  %v820_v2 = vld [vmem:[#allocation3 + $0x80] sm:$0x1]  ;;  %v823_v4 = vld [vmem:[#allocation3 + $0x98] sm:$0x1]  ;;  %v826_v6 = vld [vmem:[#allocation3 + $0xb0] sm:$0x1] }
  0x8e   :  { %1922 = vmatpush3.bf16.msra.mxu0 %v2015_v35  ;;  %v821_v3 = vsel %vm2285_vm2, 0, %v820_v2  ;;  %v824_v5 = vsel %vm2285_vm2, 0, %v823_v4  ;;  %v827_v7 = vsel %vm2285_vm2, 0, %v826_v6  ;;  %v2391_v17 = vld [vmem:[%s2541_s2] ss:$0 sm:$0xff]  ;;  %vm2418_vm14 = vmand %vm920_vm12, %vm921_vm13  ;;  %vm1526_vm2 = vcmask 1042434  }
  0x8f   :  { %1923 = vmatprep.subr.bf16.mxu0 %v2018_v41  ;;  %822 = vst [vmem:[#allocation3 + $0x80] sm:$0x1] %v821_v3  ;;  %825 = vst [vmem:[#allocation3 + $0x98] sm:$0x1] %v824_v5  ;;  %vm1536_vm7 = vcmask 1047559   ;;  %s2170_s28 = smov [#allocation12]  }
  0x90   :  { %v338_v29 = vld [vmem:[#allocation2 + $0xb0] sm:$0xff]  ;;  %1803 = vmatpush3.bf16.msra.mxu1 %v2025_v51  ;;  %828 = vst [vmem:[#allocation3 + $0xb0] sm:$0x1] %v827_v7  ;;  %s1636_s29 = sshll.u32 %s2170_s28, 4  ;;  %s1637_s29 = int_to_ptr.vmem [resolvable:$true] %s1636_s29 }
  0x91   :  { %588 = vmatmul.mubr.bf16.gmra.mrb[8].mxu0 %v322_v21  ;;  %1804 = vmatprep.subr.bf16.mxu1 %v2026_v53  ;;  %s2131_s30 = scalar_lea.vmem %s1637_s29, 128  ;;  %p2136_p5 = scmp.lt.s32.totalorder %s1637_s29, %s1637_s29 }
  0x92   :  { %595 = vmatprep.mubr.bf16.mxu0 %v326_v22  ;;  %1924 = vmatpush3.bf16.msra.mxu0 %v2018_v41  ;;  %p2132_p4 = scmp.ne.s32.totalorder %s1637_s29, %s2131_s30  ;;  %p2137_p6 = scmp.lt.s32.totalorder %s2131_s30, %s2131_s30 }
  0x93   :  { %1925 = vmatprep.subr.bf16.mxu0 %v2021_v44 }
  0x94   :  { %1805 = vmatpush3.bf16.msra.mxu1 %v2028_v55  ;;  %p2138_p7 = por %p2137_p6, %p2136_p5 }
  0x95   :  { %1806 = vmatprep.subr.bf16.mxu1 %v2029_v57 }
  0x96   :  { %1926 = vmatpush3.bf16.msra.mxu0 %v2021_v44  ;;  %p2139_p8 = pnand %p2138_p7, %p2132_p4 }
  0x97   :  { %1927 = vmatprep.subr.bf16.mxu0 %v2024_v49 }
  0x98   :  { %1807 = vmatpush3.bf16.msra.mxu1 %v2030_v58 }
  0x99   :  { %596 = vmatmul.mubr.bf16.gmra.mrb[12].mxu0 %v325_v23  ;;  %1808 = vmatprep.subr.bf16.mxu1 %v2031_v59 }
  0x9a   :  { %603 = vmatprep.mubr.bf16.mxu0 %v329_v24  ;;  %1928 = vmatpush3.bf16.msra.mxu0 %v2024_v49 }
  0x9b   :  { %1929 = vmatprep.subr.bf16.mxu0 %v2027_v52 }
  0x9c   :  { %1809 = vmatpush3.bf16.msra.mxu1 %v2032_v62 }
  0x9e   :  { %1930 = vmatpush3.bf16.msra.mxu0 %v2027_v52  ;;  %v896_v52 = vld [vmem:[#allocation3 + $0x8] sm:$0x3f] }
  0xa1   :  { %604 = vmatmul.mubr.bf16.gmra.mrb[16].mxu0 %v328_v38 }
  0xa2   :  { %611 = vmatprep.mubr.bf16.mxu0 %v332_v25 }
  0xa9   :  { %612 = vmatmul.mubr.bf16.gmra.mrb[20].mxu0 %v331_v26 }
  0xaa   :  { %619 = vmatprep.mubr.bf16.mxu0 %v335_v27 }
  0xb1   :  { %620 = vmatmul.mubr.bf16.gmra.mrb[24].mxu0 %v334_v28 }
  0xb2   :  { %627 = vmatprep.mubr.bf16.mxu0 %v338_v29 }
  0xb9   :  { %628 = vmatmul.mubr.bf16.gmra.mrb[28].mxu0 %v337_v30 }
 0x141   :  { %v1901_v8 = vpop.f32.mrb[0].mxu1 }
 0x142   :  { %v670_v9 = vpop.f32.mrb[1].mxu1 }
 0x143   :  { %v1902_v10 = vpop.f32.mrb[2].mxu1 }
 0x144   :  { %v673_v11 = vpop.f32.mrb[3].mxu1 }
 0x149   :  { %v2378_v12 = vpop.f32.mrb[4].mxu1 }
 0x14a   :  { %v686_v13 = vpop.f32.mrb[5].mxu1 }
 0x14b   :  { %v2380_v14 = vpop.f32.mrb[6].mxu1 }
 0x14c   :  { %v2382_v60 = vpop.f32.mrb[7].mxu1 }
 0x151   :  { %v2384_v15 = vpop.f32.mrb[8].mxu1 }
 0x152   :  { %v2386_v18 = vpop.f32.mrb[9].mxu1 }
 0x153   :  { %v2393_v20 = vpop.f32.mrb[10].mxu1 }
 0x154   :  { %v1730_v16 = vpop.f32.mrb[0].mxu0  ;;  %v2395_v23 = vpop.f32.mrb[11].mxu1 }
 0x155   :  { %v1731_v19 = vpop.f32.mrb[1].mxu0 }
 0x156   :  { %v1732_v21 = vadd.f32 %v1731_v19, %v1730_v16  ;;  %v1733_v22 = vpop.f32.mrb[2].mxu0  ;;  %v2036_v16 = vld [vmem:[#allocation10 + $0x18] sm:$0xff]  }
 0x157   :  { %v1734_v24 = vpop.f32.mrb[3].mxu0 }
 0x158   :  { %v574_v38 = vadd.f32 %v1732_v21, %v2391_v17  ;;  %v1735_v25 = vadd.f32 %v1734_v24, %v1733_v22 }
 0x159   :  { %v2399_v28 = vpop.f32.mrb[12].mxu1 }
 0x15a   :  { %v671_v26 = vadd.f32 %v670_v9, %v574_v38  ;;  %v577_v27 = vadd.f32 %v1735_v25, %v2391_v17  ;;  %v2401_v31 = vpop.f32.mrb[13].mxu1 }
 0x15b   :  { %v2403_v33 = vpop.f32.mrb[14].mxu1 }
 0x15c   :  { %v674_v29 = vadd.f32 %v673_v11, %v577_v27  ;;  %v1736_v30 = vpop.f32.mrb[4].mxu0  ;;  %v733_v34 = vmax.f32 %v671_v26, 0.0  ;;  %v2405_v39 = vpop.f32.mrb[15].mxu1 }
 0x15d   :  { %v1737_v32 = vpop.f32.mrb[5].mxu0 }
 0x15e   :  { %v734_v35 = vmax.f32 %v674_v29, 0.0  ;;  %v1738_v36 = vadd.f32 %v1737_v32, %v1736_v30  ;;  %v1739_v37 = vpop.f32.mrb[6].mxu0 }
 0x15f   :  { %v1740_v40 = vpop.f32.mrb[7].mxu0 }
 0x160   :  { %v749_v41 = vpack.c.bf16 %v734_v35, %v733_v34  ;;  %v582_v42 = vadd.f32 %v1738_v36, %v2391_v17  ;;  %v1741_v43 = vadd.f32 %v1740_v40, %v1739_v37 }
 0x162   :  { %v773_v44 = vrot.slane %v749_v41, 7  ;;  %v830_v45 = vshrl.u32 %v749_v41, 16  ;;  %947 = vst [vmem:[#allocation3 + $0x10] sm:$0x1f] %v749_v41  ;;  %v679_v46 = vadd.f32 %v1901_v8, %v582_v42  ;;  %v585_v47 = vadd.f32 %v1741_v43, %v2391_v17 }
 0x163   :  { %v833_v49 = vshll.u32 %v749_v41, 16 }
 0x164   :  { %789 = vst [vmem:[#allocation3] sm:$0x3e] %v773_v44  ;;  %v832_v48 = vrot.slane %v830_v45, 7  ;;  %v1742_v50 = vpop.f32.mrb[8].mxu0  ;;  %v682_v53 = vadd.f32 %v1902_v10, %v585_v47  ;;  %v735_v58 = vmax.f32 %v679_v46, 0.0 }
 0x165   :  { %v1743_v54 = vpop.f32.mrb[9].mxu0  ;;  %v902_v44 = vld [vmem:[#allocation3 + $0x38] sm:$0x3f] }
 0x166   :  { %v835_v55 = vor.u32 %v833_v49, %v832_v48  ;;  %v1744_v56 = vadd.f32 %v1743_v54, %v1742_v50  ;;  %v1745_v57 = vpop.f32.mrb[10].mxu0  ;;  %v736_v59 = vmax.f32 %v682_v53, 0.0 }
 0x167   :  { %v1746_v61 = vpop.f32.mrb[11].mxu0 }
 0x168   :  { %v897_v62 = vsel %vm2409_vm11, %v835_v55, %v896_v52  ;;  %v590_v63 = vadd.f32 %v1744_v56, %v2391_v17  ;;  %v1747_v0 = vadd.f32 %v1746_v61, %v1745_v57  ;;  %v750_v1 = vpack.c.bf16 %v736_v59, %v735_v58 }
 0x169   :  { %898 = vst [vmem:[#allocation3 + $0x8] sm:$0x3f] %v897_v62  ;;  %v965_v2 = vld [vmem:[#allocation3 + $0x10] sm:$0xff] }
 0x16a   :  { %v687_v3 = vadd.f32 %v686_v13, %v590_v63  ;;  %v593_v4 = vadd.f32 %v1747_v0, %v2391_v17  ;;  %1931 = vmatprep.mubr.bf16.mxu0 %v965_v2  ;;  %v774_v5 = vrot.slane %v750_v1, 7  ;;  %v837_v6 = vshrl.u32 %v750_v1, 16  ;;  %948 = vst [vmem:[#allocation3 + $0x28] sm:$0x1f] %v750_v1  ;;  %v899_v13 = vld [vmem:[#allocation3 + $0x20] sm:$0x3f] }
 0x16b   :  { %v840_v10 = vshll.u32 %v750_v1, 16  ;;  %v963_v63 = vld [vmem:[#allocation3] sm:$0xff] }
 0x16c   :  { %v690_v7 = vadd.f32 %v2382_v60, %v593_v4  ;;  %v1748_v8 = vpop.f32.mrb[12].mxu0  ;;  %790 = vst [vmem:[#allocation3 + $0x18] sm:$0x3e] %v774_v5  ;;  %v839_v9 = vrot.slane %v837_v6, 7  ;;  %v737_v19 = vmax.f32 %v687_v3, 0.0 }
 0x16d   :  { %v1749_v11 = vpop.f32.mrb[13].mxu0 }
 0x16e   :  { %v738_v21 = vmax.f32 %v690_v7, 0.0  ;;  %v1750_v22 = vadd.f32 %v1749_v11, %v1748_v8  ;;  %v1751_v24 = vpop.f32.mrb[14].mxu0  ;;  %v842_v38 = vor.u32 %v840_v10, %v839_v9  ;;  %v905_v7 = vld [vmem:[#allocation3 + $0x50] sm:$0x3f] }
 0x16f   :  { %v1752_v25 = vpop.f32.mrb[15].mxu0 }
 0x170   :  { %v923_v26 = vld [vmem:[#allocation3 + $0x8] sm:$0xe0]  ;;  %v751_v27 = vpack.c.bf16 %v738_v21, %v737_v19  ;;  %v598_v60 = vadd.f32 %v1750_v22, %v2391_v17  ;;  %v1753_v29 = vadd.f32 %v1752_v25, %v1751_v24  ;;  %v900_v32 = vsel %vm2409_vm11, %v842_v38, %v899_v13 }
 0x171   :  { %v924_v30 = vsel %vm2418_vm14, 0, %v923_v26  ;;  %901 = vst [vmem:[#allocation3 + $0x20] sm:$0x3f] %v900_v32  ;;  %v968_v37 = vld [vmem:[#allocation3 + $0x28] sm:$0xff] }
 0x172   :  { %925 = vst [vmem:[#allocation3 + $0x8] sm:$0xe0] %v924_v30  ;;  %v775_v34 = vrot.slane %v751_v27, 7  ;;  %v844_v35 = vshrl.u32 %v751_v27, 16  ;;  %949 = vst [vmem:[#allocation3 + $0x40] sm:$0x1f] %v751_v27  ;;  %v695_v36 = vadd.f32 %v2378_v12, %v598_v60  ;;  %v601_v40 = vadd.f32 %v1753_v29, %v2391_v17  ;;  %1932 = vmatmul.mubr.bf16.vlgmr.msra.gmra.mrb[32].mxu0 %v968_v37 }
 0x173   :  { %v847_v42 = vshll.u32 %v751_v27, 16  ;;  %v966_v32 = vld [vmem:[#allocation3 + $0x18] sm:$0xff]  ;;  %v908_v37 = vld [vmem:[#allocation3 + $0x68] sm:$0x3f] }
 0x174   :  { %791 = vst [vmem:[#allocation3 + $0x30] sm:$0x3e] %v775_v34  ;;  %v846_v41 = vrot.slane %v844_v35, 7  ;;  %v1754_v43 = vpop.f32.mrb[16].mxu0  ;;  %v698_v45 = vadd.f32 %v2380_v14, %v601_v40  ;;  %v739_v50 = vmax.f32 %v695_v36, 0.0 }
 0x175   :  { %v1755_v46 = vpop.f32.mrb[17].mxu0 }
 0x176   :  { %v849_v47 = vor.u32 %v847_v42, %v846_v41  ;;  %v1756_v48 = vadd.f32 %v1755_v46, %v1754_v43  ;;  %v1757_v49 = vpop.f32.mrb[18].mxu0  ;;  %v740_v52 = vmax.f32 %v698_v45, 0.0 }
 0x177   :  { %v1758_v53 = vpop.f32.mrb[19].mxu0 }
 0x178   :  { %v903_v12 = vsel %vm2409_vm11, %v849_v47, %v902_v44  ;;  %v606_v54 = vadd.f32 %v1756_v48, %v2391_v17  ;;  %v1759_v55 = vadd.f32 %v1758_v53, %v1757_v49  ;;  %v926_v56 = vld [vmem:[#allocation3 + $0x20] sm:$0xe0]  ;;  %v752_v57 = vpack.c.bf16 %v740_v52, %v739_v50 }
 0x179   :  { %904 = vst [vmem:[#allocation3 + $0x38] sm:$0x3f] %v903_v12  ;;  %v964_v58 = vld [vmem:[#allocation3 + $0x8] sm:$0xff]  ;;  %v971_v59 = vld [vmem:[#allocation3 + $0x40] sm:$0xff]  ;;  %v927_v14 = vsel %vm2418_vm14, 0, %v926_v56 }
 0x17a   :  { %v703_v61 = vadd.f32 %v2386_v18, %v606_v54  ;;  %v609_v62 = vadd.f32 %v1759_v55, %v2391_v17  ;;  %1218 = vmatprep.mubr.bf16.mxu1 %v964_v58  ;;  %1935 = vmatprep.mubr.bf16.mxu0 %v971_v59  ;;  %928 = vst [vmem:[#allocation3 + $0x20] sm:$0xe0] %v927_v14  ;;  %v776_v0 = vrot.slane %v752_v57, 7  ;;  %v851_v1 = vshrl.u32 %v752_v57, 16 }
 0x17b   :  { %950 = vst [vmem:[#allocation3 + $0x58] sm:$0x1f] %v752_v57  ;;  %1219 = vmatmul.mubr.bf16.vlgmr.msra.gmra.mrb[16].mxu1 %v963_v63  ;;  %v854_v5 = vshll.u32 %v752_v57, 16  ;;  %v969_v58 = vld [vmem:[#allocation3 + $0x30] sm:$0xff] }
 0x17c   :  { %v706_v2 = vadd.f32 %v2395_v23, %v609_v62  ;;  %v1760_v3 = vpop.f32.mrb[20].mxu0  ;;  %792 = vst [vmem:[#allocation3 + $0x48] sm:$0x3e] %v776_v0  ;;  %v853_v4 = vrot.slane %v851_v1, 7  ;;  %v741_v8 = vmax.f32 %v703_v61, 0.0 }
 0x17d   :  { %v1761_v6 = vpop.f32.mrb[21].mxu0  ;;  %v911_v0 = vld [vmem:[#allocation3 + $0x80] sm:$0x3f] }
 0x17e   :  { %v742_v18 = vmax.f32 %v706_v2, 0.0  ;;  %v1762_v9 = vadd.f32 %v1761_v6, %v1760_v3  ;;  %v1763_v10 = vpop.f32.mrb[22].mxu0  ;;  %v856_v11 = vor.u32 %v854_v5, %v853_v4 }
 0x17f   :  { %v1764_v13 = vpop.f32.mrb[23].mxu0 }
 0x180   :  { %v929_v19 = vld [vmem:[#allocation3 + $0x38] sm:$0xe0]  ;;  %v753_v21 = vpack.c.bf16 %v742_v18, %v741_v8  ;;  %v614_v22 = vadd.f32 %v1762_v9, %v2391_v17  ;;  %v1765_v24 = vadd.f32 %v1764_v13, %v1763_v10  ;;  %v906_v38 = vsel %vm2409_vm11, %v856_v11, %v905_v7 }
 0x181   :  { %v930_v23 = vsel %vm2418_vm14, 0, %v929_v19  ;;  %907 = vst [vmem:[#allocation3 + $0x50] sm:$0x3f] %v906_v38  ;;  %v967_v60 = vld [vmem:[#allocation3 + $0x20] sm:$0xff] }
 0x182   :  { %931 = vst [vmem:[#allocation3 + $0x38] sm:$0xe0] %v930_v23  ;;  %v777_v25 = vrot.slane %v753_v21, 7  ;;  %v858_v26 = vshrl.u32 %v753_v21, 16  ;;  %951 = vst [vmem:[#allocation3 + $0x70] sm:$0x1f] %v753_v21  ;;  %v711_v27 = vadd.f32 %v2384_v15, %v614_v22  ;;  %v617_v30 = vadd.f32 %v1765_v24, %v2391_v17  ;;  %1226 = vmatprep.mubr.bf16.mxu1 %v967_v60 }
 0x183   :  { %v974_v29 = vld [vmem:[#allocation3 + $0x58] sm:$0xff]  ;;  %v861_v35 = vshll.u32 %v753_v21, 16  ;;  %1227 = vmatmul.mubr.bf16.gmra.mrb[20].mxu1 %v966_v32  ;;  %v972_v24 = vld [vmem:[#allocation3 + $0x48] sm:$0xff] }
 0x184   :  { %1936 = vmatmul.mubr.bf16.gmra.mrb[36].mxu0 %v974_v29  ;;  %793 = vst [vmem:[#allocation3 + $0x60] sm:$0x3e] %v777_v25  ;;  %v860_v34 = vrot.slane %v858_v26, 7  ;;  %v1766_v36 = vpop.f32.mrb[24].mxu0  ;;  %v714_v40 = vadd.f32 %v2393_v20, %v617_v30  ;;  %v743_v15 = vmax.f32 %v711_v27, 0.0 }
 0x185   :  { %v1767_v41 = vpop.f32.mrb[25].mxu0  ;;  %v914_v25 = vld [vmem:[#allocation3 + $0x98] sm:$0x3f] }
 0x186   :  { %v863_v42 = vor.u32 %v861_v35, %v860_v34  ;;  %v1768_v43 = vadd.f32 %v1767_v41, %v1766_v36  ;;  %v1769_v44 = vpop.f32.mrb[26].mxu0  ;;  %v744_v45 = vmax.f32 %v714_v40, 0.0 }
 0x187   :  { %v1770_v46 = vpop.f32.mrb[27].mxu0 }
 0x188   :  { %v909_v47 = vsel %vm2409_vm11, %v863_v42, %v908_v37  ;;  %v622_v48 = vadd.f32 %v1768_v43, %v2391_v17  ;;  %v1771_v49 = vadd.f32 %v1770_v46, %v1769_v44  ;;  %v932_v50 = vld [vmem:[#allocation3 + $0x50] sm:$0xe0]  ;;  %v754_v52 = vpack.c.bf16 %v744_v45, %v743_v15 }
 0x189   :  { %910 = vst [vmem:[#allocation3 + $0x68] sm:$0x3f] %v909_v47  ;;  %v970_v53 = vld [vmem:[#allocation3 + $0x38] sm:$0xff]  ;;  %v977_v12 = vld [vmem:[#allocation3 + $0x70] sm:$0xff]  ;;  %v933_v20 = vsel %vm2418_vm14, 0, %v932_v50 }
 0x18a   :  { %v719_v54 = vadd.f32 %v2401_v31, %v622_v48  ;;  %v625_v55 = vadd.f32 %v1771_v49, %v2391_v17  ;;  %1234 = vmatprep.mubr.bf16.mxu1 %v970_v53  ;;  %1939 = vmatprep.mubr.bf16.mxu0 %v977_v12  ;;  %934 = vst [vmem:[#allocation3 + $0x50] sm:$0xe0] %v933_v20  ;;  %v778_v56 = vrot.slane %v754_v52, 7  ;;  %v865_v57 = vshrl.u32 %v754_v52, 16  ;;  %v917_v42 = vld [vmem:[#allocation3 + $0xb0] sm:$0x3f] }
 0x18b   :  { %952 = vst [vmem:[#allocation3 + $0x88] sm:$0x1f] %v754_v52  ;;  %1235 = vmatmul.mubr.bf16.gmra.mrb[24].mxu1 %v969_v58  ;;  %v868_v62 = vshll.u32 %v754_v52, 16  ;;  %v2033_v20 = vld [vmem:[#allocation10] sm:$0xff]   ;;  %v2038_v58 = vld [vmem:[#allocation10 + $0x28] sm:$0xff]  }
 0x18c   :  { %v722_v59 = vadd.f32 %v2405_v39, %v625_v55  ;;  %v1772_v14 = vpop.f32.mrb[28].mxu0  ;;  %794 = vst [vmem:[#allocation3 + $0x78] sm:$0x3e] %v778_v56  ;;  %v867_v61 = vrot.slane %v865_v57, 7  ;;  %v745_v1 = vmax.f32 %v719_v54, 0.0  ;;  %v2168_v54 = vmov 0.0  }
 0x18d   :  { %v1773_v63 = vpop.f32.mrb[29].mxu0  ;;  %1947 = vmatprep.subr.bf16.mxu0 %v2168_v54  ;;  %v2034_v55 = vld [vmem:[#allocation10 + $0x8] sm:$0xff]   ;;  %v2035_v56 = vld [vmem:[#allocation10 + $0x10] sm:$0xff]   ;;  %v2037_v57 = vld [vmem:[#allocation10 + $0x20] sm:$0xff]  }
 0x18e   :  { %v746_v31 = vmax.f32 %v722_v59, 0.0  ;;  %v1774_v2 = vadd.f32 %v1773_v63, %v1772_v14  ;;  %v1775_v3 = vpop.f32.mrb[30].mxu0  ;;  %v870_v4 = vor.u32 %v868_v62, %v867_v61  ;;  %1948 = vmatpush3.bf16.msra.mxu0 %v2033_v20  ;;  %v2039_v59 = vld [vmem:[#allocation10 + $0x30] sm:$0xff]   ;;  %v2040_v14 = vld [vmem:[#allocation10 + $0x38] sm:$0xff]  }
 0x18f   :  { %v1776_v5 = vpop.f32.mrb[31].mxu0  ;;  %1949 = vmatprep.subr.bf16.mxu0 %v2168_v54 }
 0x190   :  { %v935_v6 = vld [vmem:[#allocation3 + $0x68] sm:$0xe0]  ;;  %v755_v7 = vpack.c.bf16 %v746_v31, %v745_v1  ;;  %v630_v8 = vadd.f32 %v1774_v2, %v2391_v17  ;;  %v1777_v18 = vadd.f32 %v1776_v5, %v1775_v3  ;;  %v912_v9 = vsel %vm2409_vm11, %v870_v4, %v911_v0  ;;  %v2475_v2 = vld [vmem:[%s2543_s4] ss:$0 sm:$0xff] }
 0x191   :  { %v936_v39 = vsel %vm2418_vm14, 0, %v935_v6  ;;  %913 = vst [vmem:[#allocation3 + $0x80] sm:$0x3f] %v912_v9  ;;  %v973_v19 = vld [vmem:[#allocation3 + $0x50] sm:$0xff]  ;;  %v1396_v1 = vlaneseq }
 0x192   :  { %937 = vst [vmem:[#allocation3 + $0x68] sm:$0xe0] %v936_v39  ;;  %v779_v10 = vrot.slane %v755_v7, 7  ;;  %v872_v11 = vshrl.u32 %v755_v7, 16  ;;  %953 = vst [vmem:[#allocation3 + $0xa0] sm:$0x1f] %v755_v7  ;;  %v727_v13 = vadd.f32 %v2399_v28, %v630_v8  ;;  %v633_v22 = vadd.f32 %v1777_v18, %v2391_v17  ;;  %1242 = vmatprep.mubr.bf16.mxu1 %v973_v19 }
 0x193   :  { %v980_v21 = vld [vmem:[#allocation3 + $0x88] sm:$0xff]  ;;  %v875_v38 = vshll.u32 %v755_v7, 16  ;;  %1243 = vmatmul.mubr.bf16.gmra.mrb[28].mxu1 %v972_v24  ;;  %v978_v48 = vld [vmem:[#allocation3 + $0x78] sm:$0xff]  ;;  %1950 = vmatpush3.bf16.msra.mxu0 %v2034_v55  ;;  %v1397_v4 = vshrl.u32 %v1396_v1, 7 }
 0x194   :  { %1940 = vmatmul.mubr.bf16.gmra.mrb[40].mxu0 %v980_v21  ;;  %795 = vst [vmem:[#allocation3 + $0x90] sm:$0x3e] %v779_v10  ;;  %v874_v23 = vrot.slane %v872_v11, 7  ;;  %v730_v26 = vadd.f32 %v2403_v33, %v633_v22  ;;  %v747_v60 = vmax.f32 %v727_v13, 0.0  ;;  %v975_v33 = vld [vmem:[#allocation3 + $0x60] sm:$0xff]  ;;  %1951 = vmatprep.subr.bf16.mxu0 %v2168_v54 }
 0x195   :  { %v2478_v39 = vadd.s32 8, %v1397_v4 }
 0x196   :  { %v877_v27 = vor.u32 %v875_v38, %v874_v23  ;;  %v748_v29 = vmax.f32 %v730_v26, 0.0 }
 0x197   :  { %1952 = vmatpush3.bf16.msra.mxu0 %v2035_v56  ;;  %vm1400_vm0 = vcmp.lt.s32.totalorder %v2478_v39, 12 }
 0x198   :  { %v915_v28 = vsel %vm2409_vm11, %v877_v27, %v914_v25  ;;  %v938_v30 = vld [vmem:[#allocation3 + $0x80] sm:$0xe0]  ;;  %v756_v32 = vpack.c.bf16 %v748_v29, %v747_v60  ;;  %1953 = vmatprep.subr.bf16.mxu0 %v2168_v54 }
 0x199   :  { %916 = vst [vmem:[#allocation3 + $0x98] sm:$0x3f] %v915_v28  ;;  %v976_v17 = vld [vmem:[#allocation3 + $0x68] sm:$0xff]  ;;  %v983_v34 = vld [vmem:[#allocation3 + $0xa0] sm:$0xff]  ;;  %v939_v35 = vsel %vm2418_vm14, 0, %v938_v30 }
 0x19a   :  { %1250 = vmatprep.mubr.bf16.mxu1 %v976_v17  ;;  %1943 = vmatprep.mubr.bf16.mxu0 %v983_v34  ;;  %940 = vst [vmem:[#allocation3 + $0x80] sm:$0xe0] %v939_v35  ;;  %v780_v36 = vrot.slane %v756_v32, 7  ;;  %v879_v37 = vshrl.u32 %v756_v32, 16  ;;  %954 = vst [vmem:[#allocation3 + $0xb8] sm:$0x1f] %v756_v32 }
 0x19b   :  { %1251 = vmatmul.mubr.bf16.gmra.mrb[32].mxu1 %v975_v33  ;;  %v882_v41 = vshll.u32 %v756_v32, 16  ;;  %v981_v53 = vld [vmem:[#allocation3 + $0x90] sm:$0xff]  ;;  %1954 = vmatpush3.bf16.msra.mxu0 %v2036_v16 }
 0x19c   :  { %796 = vst [vmem:[#allocation3 + $0xa8] sm:$0x3e] %v780_v36  ;;  %v881_v40 = vrot.slane %v879_v37, 7  ;;  %1955 = vmatprep.subr.bf16.mxu0 %v2168_v54 }
 0x19e   :  { %v884_v43 = vor.u32 %v882_v41, %v881_v40 }
 0x19f   :  { %1956 = vmatpush3.bf16.msra.mxu0 %v2037_v57 }
 0x1a0   :  { %v941_v44 = vld [vmem:[#allocation3 + $0x98] sm:$0xe0]  ;;  %v918_v45 = vsel %vm2409_vm11, %v884_v43, %v917_v42  ;;  %1957 = vmatprep.subr.bf16.mxu0 %v2168_v54 }
 0x1a1   :  { %v942_v15 = vsel %vm2418_vm14, 0, %v941_v44  ;;  %919 = vst [vmem:[#allocation3 + $0xb0] sm:$0x3f] %v918_v45  ;;  %v979_v46 = vld [vmem:[#allocation3 + $0x80] sm:$0xff]  ;;  %v986_v47 = vld [vmem:[#allocation3 + $0xb8] sm:$0xff] }
 0x1a2   :  { %943 = vst [vmem:[#allocation3 + $0x98] sm:$0xe0] %v942_v15  ;;  %1258 = vmatprep.mubr.bf16.mxu1 %v979_v46  ;;  %1944 = vmatmul.mubr.bf16.gmra.mrb[44].mxu0 %v986_v47 }
 0x1a3   :  { %1259 = vmatmul.mubr.bf16.gmra.mrb[36].mxu1 %v978_v48  ;;  %v984_v51 = vld [vmem:[#allocation3 + $0xa8] sm:$0xff]  ;;  %1958 = vmatpush3.bf16.msra.mxu0 %v2038_v58 }
 0x1a4   :  { %1959 = vmatprep.subr.bf16.mxu0 %v2168_v54  ;;  %1963 = vmatprep.mubr.msk.bf16.mxu0 %vm2169_vm15, %v2168_v54 }
 0x1a7   :  { %1960 = vmatpush3.bf16.msra.mxu0 %v2039_v59 }
 0x1a8   :  { %v944_v49 = vld [vmem:[#allocation3 + $0xb0] sm:$0xe0]  ;;  %1961 = vmatprep.subr.bf16.mxu0 %v2168_v54 }
 0x1a9   :  { %v982_v50 = vld [vmem:[#allocation3 + $0x98] sm:$0xff]  ;;  %v945_v52 = vsel %vm2418_vm14, 0, %v944_v49 }
 0x1aa   :  { %1266 = vmatprep.mubr.bf16.mxu1 %v982_v50  ;;  %946 = vst [vmem:[#allocation3 + $0xb0] sm:$0xe0] %v945_v52 }
 0x1ab   :  { %1267 = vmatmul.mubr.bf16.gmra.mrb[40].mxu1 %v981_v53  ;;  %1962 = vmatpush3.bf16.msra.mxu0 %v2040_v14 }
 0x1b1   :  { %v985_v12 = vld [vmem:[#allocation3 + $0xb0] sm:$0xff] }
 0x1b2   :  { %1274 = vmatprep.mubr.bf16.mxu1 %v985_v12 }
 0x1b3   :  { %1275 = vmatmul.mubr.bf16.gmra.mrb[44].mxu1 %v984_v51 }
 0x245   :  { %v1933_v61 = vpop.f32.mrb[32].mxu0 }
 0x246   :  { %v1317_v62 = vpop.f32.mrb[33].mxu0 }
 0x247   :  { %v1934_v63 = vpop.f32.mrb[34].mxu0 }
 0x248   :  { %v1320_v0 = vpop.f32.mrb[35].mxu0 }
 0x24e   :  { %v1810_v31 = vpop.f32.mrb[16].mxu1 }
 0x24f   :  { %v1811_v3 = vpop.f32.mrb[17].mxu1 }
 0x250   :  { %v1812_v5 = vadd.f32 %v1811_v3, %v1810_v31  ;;  %v1813_v6 = vpop.f32.mrb[18].mxu1 }
 0x251   :  { %v1814_v7 = vpop.f32.mrb[19].mxu1 }
 0x252   :  { %v1221_v8 = vadd.f32 %v1812_v5, %v2475_v2  ;;  %v1815_v18 = vadd.f32 %v1814_v7, %v1813_v6 }
 0x254   :  { %v1318_v9 = vadd.f32 %v1317_v62, %v1221_v8  ;;  %v1224_v10 = vadd.f32 %v1815_v18, %v2475_v2 }
 0x256   :  { %v1321_v11 = vadd.f32 %v1320_v0, %v1224_v10  ;;  %v1816_v19 = vpop.f32.mrb[20].mxu1  ;;  %v1380_v38 = vmax.f32 %v1318_v9, 0.0 }
 0x257   :  { %v1937_v13 = vpop.f32.mrb[36].mxu0  ;;  %v1817_v24 = vpop.f32.mrb[21].mxu1 }
 0x258   :  { %v1333_v21 = vpop.f32.mrb[37].mxu0  ;;  %v1381_v22 = vmax.f32 %v1321_v11, 0.0  ;;  %v1818_v25 = vadd.f32 %v1817_v24, %v1816_v19  ;;  %v1819_v26 = vpop.f32.mrb[22].mxu1 }
 0x259   :  { %v1938_v23 = vpop.f32.mrb[38].mxu0  ;;  %v1820_v29 = vpop.f32.mrb[23].mxu1 }
 0x25a   :  { %v1336_v27 = vpop.f32.mrb[39].mxu0  ;;  %v1406_v60 = vsel %vm1400_vm0, %v1381_v22, 0.0  ;;  %v1229_v30 = vadd.f32 %v1818_v25, %v2475_v2  ;;  %v1821_v32 = vadd.f32 %v1820_v29, %v1819_v26 }
 0x25b   :  { %v1421_v28 = vmax.f32 %v1380_v38, %v1406_v60 }
 0x25c   :  { %v1326_v34 = vadd.f32 %v1933_v61, %v1229_v30  ;;  %v1232_v35 = vadd.f32 %v1821_v32, %v2475_v2 }
 0x25d   :  { %v1422_v17 = vrot.slane %v1421_v28, 4 }
 0x25e   :  { %v1329_v37 = vadd.f32 %v1934_v63, %v1232_v35  ;;  %v1822_v33 = vpop.f32.mrb[24].mxu1  ;;  %v1382_v15 = vmax.f32 %v1326_v34, 0.0 }
 0x25f   :  { %v1423_v36 = vmax.f32 %v1421_v28, %v1422_v17  ;;  %v1823_v40 = vpop.f32.mrb[25].mxu1 }
 0x260   :  { %v1383_v42 = vmax.f32 %v1329_v37, 0.0  ;;  %v1824_v43 = vadd.f32 %v1823_v40, %v1822_v33  ;;  %v1825_v44 = vpop.f32.mrb[26].mxu1 }
 0x261   :  { %v1424_v41 = vrot.slane %v1423_v36, 2  ;;  %v1826_v45 = vpop.f32.mrb[27].mxu1 }
 0x262   :  { %v1408_v46 = vsel %vm1400_vm0, %v1383_v42, 0.0  ;;  %v1237_v47 = vadd.f32 %v1824_v43, %v2475_v2  ;;  %v1827_v48 = vadd.f32 %v1826_v45, %v1825_v44 }
 0x263   :  { %v1425_v49 = vmax.f32 %v1423_v36, %v1424_v41  ;;  %v1428_v50 = vmax.f32 %v1382_v15, %v1408_v46 }
 0x264   :  { %v1334_v52 = vadd.f32 %v1333_v21, %v1237_v47  ;;  %v1240_v53 = vadd.f32 %v1827_v48, %v2475_v2 }
 0x265   :  { %v1429_v12 = vrot.slane %v1428_v50, 4  ;;  %v1426_v56 = vrot.slane %v1425_v49, 1 }
 0x266   :  { %v1337_v20 = vadd.f32 %v1336_v27, %v1240_v53  ;;  %v1828_v54 = vpop.f32.mrb[28].mxu1  ;;  %v1384_v0 = vmax.f32 %v1334_v52, 0.0 }
 0x267   :  { %v2490_v51 = vpop.f32.mrb[40].mxu0  ;;  %v1430_v16 = vmax.f32 %v1428_v50, %v1429_v12  ;;  %v1829_v57 = vpop.f32.mrb[29].mxu1  ;;  %v1427_v5 = vmax.f32 %v1425_v49, %v1426_v56 }
 0x268   :  { %v1349_v55 = vpop.f32.mrb[41].mxu0  ;;  %v1385_v59 = vmax.f32 %v1337_v20, 0.0  ;;  %v1830_v14 = vadd.f32 %v1829_v57, %v1828_v54  ;;  %v1831_v61 = vpop.f32.mrb[30].mxu1 }
 0x269   :  { %v2492_v58 = vpop.f32.mrb[42].mxu0  ;;  %v1431_v63 = vrot.slane %v1430_v16, 2  ;;  %v1832_v1 = vpop.f32.mrb[31].mxu1  ;;  %v1477_v21 = vpack.c.bf16 %v1427_v5, %v1427_v5 }
 0x26a   :  { %v1352_v62 = vpop.f32.mrb[43].mxu0  ;;  %v1410_v31 = vsel %vm1400_vm0, %v1385_v59, 0.0  ;;  %v1245_v3 = vadd.f32 %v1830_v14, %v2475_v2  ;;  %v1833_v4 = vadd.f32 %v1832_v1, %v1831_v61 }
 0x26b   :  { %v1432_v6 = vmax.f32 %v1430_v16, %v1431_v63  ;;  %v1435_v7 = vmax.f32 %v1384_v0, %v1410_v31 }
 0x26c   :  { %v1342_v8 = vadd.f32 %v1937_v13, %v1245_v3  ;;  %v1248_v18 = vadd.f32 %v1833_v4, %v2475_v2 }
 0x26d   :  { %v1433_v9 = vrot.slane %v1432_v6, 1  ;;  %v1436_v10 = vrot.slane %v1435_v7, 4 }
 0x26e   :  { %v1345_v11 = vadd.f32 %v1938_v23, %v1248_v18  ;;  %v1834_v19 = vpop.f32.mrb[32].mxu1  ;;  %v1386_v28 = vmax.f32 %v1342_v8, 0.0  ;;  %v1516_v23 = vunpack.c.l.b16 %v1477_v21 }
 0x26f   :  { %v1434_v22 = vmax.f32 %v1432_v6, %v1433_v9  ;;  %v1437_v24 = vmax.f32 %v1435_v7, %v1436_v10  ;;  %v1835_v38 = vpop.f32.mrb[33].mxu1 }
 0x270   :  { %v1387_v25 = vmax.f32 %v1345_v11, 0.0  ;;  %v1836_v26 = vadd.f32 %v1835_v38, %v1834_v19  ;;  %v1837_v27 = vpop.f32.mrb[34].mxu1 }
 0x271   :  { %v1478_v60 = vpack.c.bf16 %v1434_v22, %v1434_v22  ;;  %v1438_v29 = vrot.slane %v1437_v24, 2  ;;  %v1838_v30 = vpop.f32.mrb[35].mxu1 }
 0x272   :  { %v1412_v13 = vsel %vm1400_vm0, %v1387_v25, 0.0  ;;  %v1253_v32 = vadd.f32 %v1836_v26, %v2475_v2  ;;  %v1839_v17 = vadd.f32 %v1838_v30, %v1837_v27 }
 0x273   :  { %v1517_v34 = vunpack.c.l.b16 %v1478_v60  ;;  %v1439_v35 = vmax.f32 %v1437_v24, %v1438_v29  ;;  %v1442_v36 = vmax.f32 %v1386_v28, %v1412_v13 }
 0x274   :  { %v1350_v37 = vadd.f32 %v1349_v55, %v1253_v32  ;;  %v1256_v33 = vadd.f32 %v1839_v17, %v2475_v2 }
 0x275   :  { %v1525_v40 = vsel %vm1524_vm1, %v1517_v34, %v1516_v23  ;;  %v1440_v41 = vrot.slane %v1439_v35, 1  ;;  %v1443_v42 = vrot.slane %v1442_v36, 4  ;;  %v2502_v43 = vpop.f32.mrb[44].mxu0 }
 0x276   :  { %v1353_v44 = vadd.f32 %v1352_v62, %v1256_v33  ;;  %v1840_v15 = vpop.f32.mrb[36].mxu1  ;;  %v1365_v45 = vpop.f32.mrb[45].mxu0  ;;  %v1388_v55 = vmax.f32 %v1350_v37, 0.0 }
 0x277   :  { %v1441_v46 = vmax.f32 %v1439_v35, %v1440_v41  ;;  %v1444_v47 = vmax.f32 %v1442_v36, %v1443_v42  ;;  %v1841_v48 = vpop.f32.mrb[37].mxu1  ;;  %v2504_v49 = vpop.f32.mrb[46].mxu0 }
 0x278   :  { %v1389_v50 = vmax.f32 %v1353_v44, 0.0  ;;  %v1842_v52 = vadd.f32 %v1841_v48, %v1840_v15  ;;  %v1843_v53 = vpop.f32.mrb[38].mxu1  ;;  %v1368_v12 = vpop.f32.mrb[47].mxu0 }
 0x279   :  { %v1479_v20 = vpack.c.bf16 %v1441_v46, %v1441_v46  ;;  %v1445_v54 = vrot.slane %v1444_v47, 2  ;;  %v1844_v56 = vpop.f32.mrb[39].mxu1 }
 0x27a   :  { %v1414_v16 = vsel %vm1400_vm0, %v1389_v50, 0.0  ;;  %v1261_v57 = vadd.f32 %v1842_v52, %v2475_v2  ;;  %v1845_v59 = vadd.f32 %v1844_v56, %v1843_v53 }
 0x27b   :  { %v1518_v14 = vunpack.c.l.b16 %v1479_v20  ;;  %v1446_v61 = vmax.f32 %v1444_v47, %v1445_v54  ;;  %v1449_v62 = vmax.f32 %v1388_v55, %v1414_v16 }
 0x27c   :  { %v1358_v63 = vadd.f32 %v2490_v51, %v1261_v57  ;;  %v1264_v0 = vadd.f32 %v1845_v59, %v2475_v2 }
 0x27d   :  { %v1527_v1 = vsel %vm1526_vm2, %v1518_v14, %v1525_v40  ;;  %v1447_v31 = vrot.slane %v1446_v61, 1  ;;  %v1450_v3 = vrot.slane %v1449_v62, 4 }
 0x27e   :  { %v1361_v4 = vadd.f32 %v2492_v58, %v1264_v0  ;;  %v1846_v5 = vpop.f32.mrb[40].mxu1  ;;  %v1390_v21 = vmax.f32 %v1358_v63, 0.0 }
 0x27f   :  { %v1448_v6 = vmax.f32 %v1446_v61, %v1447_v31  ;;  %v1451_v7 = vmax.f32 %v1449_v62, %v1450_v3  ;;  %v1847_v8 = vpop.f32.mrb[41].mxu1 }
 0x280   :  { %v1391_v18 = vmax.f32 %v1361_v4, 0.0  ;;  %v1848_v9 = vadd.f32 %v1847_v8, %v1846_v5  ;;  %v1849_v10 = vpop.f32.mrb[42].mxu1 }
 0x281   :  { %v1480_v11 = vpack.c.bf16 %v1448_v6, %v1448_v6  ;;  %v1452_v19 = vrot.slane %v1451_v7, 2  ;;  %v1850_v22 = vpop.f32.mrb[43].mxu1 }
 0x282   :  { %v1416_v51 = vsel %vm1400_vm0, %v1391_v18, 0.0  ;;  %v1269_v24 = vadd.f32 %v1848_v9, %v2475_v2  ;;  %v1851_v38 = vadd.f32 %v1850_v22, %v1849_v10 }
 0x283   :  { %v1519_v25 = vunpack.c.l.b16 %v1480_v11  ;;  %v1453_v58 = vmax.f32 %v1451_v7, %v1452_v19  ;;  %v1456_v26 = vmax.f32 %v1390_v21, %v1416_v51  ;;  %v1705_v19 = vld [vmem:[%s2545_s6] ss:$0 sm:$0xff] }
 0x284   :  { %v1366_v27 = vadd.f32 %v1365_v45, %v1269_v24  ;;  %v1272_v60 = vadd.f32 %v1851_v38, %v2475_v2 }
 0x285   :  { %v1529_v29 = vsel %vm1528_vm3, %v1519_v25, %v1527_v1  ;;  %v1454_v28 = vrot.slane %v1453_v58, 1  ;;  %v1457_v30 = vrot.slane %v1456_v26, 4 }
 0x286   :  { %v1369_v13 = vadd.f32 %v1368_v12, %v1272_v60  ;;  %v1852_v32 = vpop.f32.mrb[44].mxu1  ;;  %v1392_v41 = vmax.f32 %v1366_v27, 0.0 }
 0x287   :  { %v1455_v17 = vmax.f32 %v1453_v58, %v1454_v28  ;;  %v1458_v23 = vmax.f32 %v1456_v26, %v1457_v30  ;;  %v1853_v34 = vpop.f32.mrb[45].mxu1 }
 0x288   :  { %v1393_v35 = vmax.f32 %v1369_v13, 0.0  ;;  %v1854_v36 = vadd.f32 %v1853_v34, %v1852_v32  ;;  %v1855_v37 = vpop.f32.mrb[46].mxu1 }
 0x289   :  { %v1481_v33 = vpack.c.bf16 %v1455_v17, %v1455_v17  ;;  %v1459_v40 = vrot.slane %v1458_v23, 2  ;;  %v1856_v42 = vpop.f32.mrb[47].mxu1 }
 0x28a   :  { %v1418_v44 = vsel %vm1400_vm0, %v1393_v35, 0.0  ;;  %v1277_v15 = vadd.f32 %v1854_v36, %v2475_v2  ;;  %v1857_v45 = vadd.f32 %v1856_v42, %v1855_v37 }
 0x28b   :  { %v1520_v46 = vunpack.c.l.b16 %v1481_v33  ;;  %v1460_v47 = vmax.f32 %v1458_v23, %v1459_v40  ;;  %v1463_v48 = vmax.f32 %v1392_v41, %v1418_v44 }
 0x28c   :  { %v1374_v50 = vadd.f32 %v2502_v43, %v1277_v15  ;;  %v1280_v52 = vadd.f32 %v1857_v45, %v2475_v2 }
 0x28d   :  { %v1461_v53 = vrot.slane %v1460_v47, 1  ;;  %v1464_v12 = vrot.slane %v1463_v48, 4  ;;  %v1531_v20 = vsel %vm1530_vm4, %v1520_v46, %v1529_v29 }
 0x28e   :  { %v1377_v54 = vadd.f32 %v2504_v49, %v1280_v52  ;;  %v1394_v14 = vmax.f32 %v1374_v50, 0.0 }
 0x28f   :  { %v1462_v55 = vmax.f32 %v1460_v47, %v1461_v53  ;;  %v1465_v56 = vmax.f32 %v1463_v48, %v1464_v12 }
 0x290   :  { %v1395_v16 = vmax.f32 %v1377_v54, 0.0 }
 0x291   :  { %v1482_v57 = vpack.c.bf16 %v1462_v55, %v1462_v55  ;;  %v1466_v59 = vrot.slane %v1465_v56, 2 }
 0x292   :  { %v1420_v61 = vsel %vm1400_vm0, %v1395_v16, 0.0 }
 0x293   :  { %v1521_v62 = vunpack.c.l.b16 %v1482_v57  ;;  %v1467_v63 = vmax.f32 %v1465_v56, %v1466_v59  ;;  %v1470_v43 = vmax.f32 %v1394_v14, %v1420_v61 }
 0x295   :  { %v1468_v0 = vrot.slane %v1467_v63, 1  ;;  %v1471_v2 = vrot.slane %v1470_v43, 4  ;;  %v1533_v1 = vsel %vm1532_vm5, %v1521_v62, %v1531_v20 }
 0x297   :  { %v1469_v31 = vmax.f32 %v1467_v63, %v1468_v0  ;;  %v1472_v3 = vmax.f32 %v1470_v43, %v1471_v2 }
 0x299   :  { %v1483_v4 = vpack.c.bf16 %v1469_v31, %v1469_v31  ;;  %v1473_v49 = vrot.slane %v1472_v3, 2 }
 0x29b   :  { %v1522_v5 = vunpack.c.l.b16 %v1483_v4  ;;  %v1474_v6 = vmax.f32 %v1472_v3, %v1473_v49 }
 0x29d   :  { %v1475_v7 = vrot.slane %v1474_v6, 1  ;;  %v1535_v8 = vsel %vm1534_vm6, %v1522_v5, %v1533_v1 }
 0x29f   :  { %v1476_v18 = vmax.f32 %v1474_v6, %v1475_v7 }
 0x2a1   :  { %v1484_v9 = vpack.c.bf16 %v1476_v18, %v1476_v18 }
 0x2a3   :  { %v1523_v39 = vunpack.c.l.b16 %v1484_v9 }
 0x2a5   :  { %v1537_v10 = vsel %vm1536_vm7, %v1523_v39, %v1535_v8 }
 0x2a6   :  { %v1538_v11 = vpack.c.b16 %v1537_v10, %v1537_v10 }
 0x2a8   :  { %1964 = vmatmul.mubr.bf16.vlgmr.msra.gmra.mrb[48].mxu0 %v1538_v11 }
 0x37b   :  { %v1622_v21 = vpop.f32.mrb[48].mxu0 }
 0x37c   :  { %v1623_v22 = vadd.f32 %v1705_v19, %v1622_v21  ;;  %v1965_v51 = vpop.f32.mrb[49].mxu0 }
 0x37d   :  { %v1625_v24 = vpop.f32.mrb[50].mxu0 }
 0x37e   :  { %2041 = vtanh.f32 %v1623_v22  ;;  %v1966_v38 = vpop.f32.mrb[51].mxu0 }
 0x388   :  { %v2042_v25 = vpop.eup %2041 }
 0x389   :  { %1629 = vst [vmem:[#allocation12] sm:$0xff] %v2042_v25 }
 0x38a   :  { %2142 = shalt.err (!%p2139_p8)
}
 0x38b   :  { %s2143_s9 = scalar_lea.hbm %s2546_s7, 128 }
 0x38c   :  { %p2144_p9 = scmp.ne.s32.totalorder %s2546_s7, %s2143_s9  ;;  %p2147_p10 = scmp.lt.u32.totalorder %s2143_s9, %s2546_s7 }
 0x38e   :  { %p2149_p11 = pnand %p2147_p10, %p2144_p9 }
 0x390   :  { %2152 = shalt.err (!%p2149_p11)
}
 0x391   :  { %1639 = dma.vmem_to_hbm [thread:$0]  %s1637_s29, 128, %s2546_s7, [#allocation6]  }
 0x392   :  { %2159 = dma.done.wait [#allocation6], 128  }
 0x393   :  { %2160 = vsyncadd [#allocation6], 4294967168 }
 0x394   :  { %1643 = vsyncpa [#allocation5], 1 }
 0x395   :  { %1644 = vsyncpa [#allocation8], 1 }
 0x396   :  { %1645 = vsyncpa [#allocation11], 1 }
 0x397   :  { %1646 = vsyncpa [#allocation6], 1 }

</bundles_post_ra>
